<compile_context>
chip_gen: v5e
topology: v5e:2x2
jax: 0.10.0
libtpu: 0.0.40
codegen_flags: <defaults>
</compile_context>

<pallas_src>
import math
from functools import partial

import jax
import jax.numpy as jnp
from jax.experimental import pallas as pl
from jax.experimental.pallas import tpu as pltpu

EPS_LN = 1e-5
EPS_BN = 1e-5
NEG_INF = float("-inf")


def _vmem_limit_bytes():
    cap = 64 * 1024 * 1024  # conservative default = v7x per-TC VMEM
    try:
        cap = int(pltpu.get_tpu_info().vmem_capacity_bytes)
    except Exception:
        pass
    return int(min(cap * 3 // 4, 100 * 1024 * 1024))


def _layernorm(x, w, b):
    mu = jnp.mean(x, axis=-1, keepdims=True)
    var = jnp.mean((x - mu) ** 2, axis=-1, keepdims=True)
    return (x - mu) * jax.lax.rsqrt(var + EPS_LN) * w + b


# ---------------------------------------------------------------------------
# Fused transformer blocks kernel: grid = (batch_block, layer)
# ---------------------------------------------------------------------------
def _blocks_kernel(T, H,
                   x_ref, mask_ref, sp_ref,
                   wq_ref, wk_ref, wv_ref, wpr_ref,
                   wfc_ref, bfc_ref, wfp_ref,
                   out_ref, acc_ref, att_ref):
    l = pl.program_id(1)
    n_layer = pl.num_programs(1)
    R, C = out_ref.shape              # R = BB * T rows
    BB = R // T
    D = C // H
    scale = 1.0 / math.sqrt(D)

    # layer 0: seed the resident residual stream from the input block
    @pl.when(l == 0)
    def _():
        acc_ref[...] = x_ref[...]

    x = acc_ref[...]                  # (R, C) f32 residual stream
    sp = sp_ref[0]                    # (9, C): ln1 w/b, ln2 w/b, bq, bk, bv, bpr, bmlp

    # ---- causal multi-head self-attention ---------------------------------
    h = _layernorm(x, sp[0:1], sp[1:2]).astype(jnp.bfloat16)
    q = jnp.dot(h, wq_ref[0], preferred_element_type=jnp.float32) + sp[4:5]
    k = jnp.dot(h, wk_ref[0], preferred_element_type=jnp.float32) + sp[5:6]
    v = jnp.dot(h, wv_ref[0], preferred_element_type=jnp.float32) + sp[6:7]
    qb = q.astype(jnp.bfloat16)
    kb = k.astype(jnp.bfloat16)
    vb = v.astype(jnp.bfloat16)

    mask = mask_ref[...]              # (T, T) additive causal mask (0 / -inf), resident
    # TODO(synk): for long T, switch to KV-tiled online softmax to bound the
    # per-step score live set (and add a query-tile parallel axis for v7x 2-TC).
    for bb in range(BB):              # static, small (BB <= 4)
        r0 = bb * T
        for hh in range(H):           # static
            c0 = hh * D
            qh = qb[r0:r0 + T, c0:c0 + D]
            kh = kb[r0:r0 + T, c0:c0 + D]
            vh = vb[r0:r0 + T, c0:c0 + D]
            s = jnp.dot(qh, kh.T, preferred_element_type=jnp.float32) * scale + mask
            m = jnp.max(s, axis=-1, keepdims=True)
            e = jnp.exp(s - m)
            p = (e * pl.reciprocal(jnp.sum(e, axis=-1, keepdims=True),
                                   approx=True)).astype(jnp.bfloat16)
            att_ref[r0:r0 + T, c0:c0 + D] = jnp.dot(
                p, vh, preferred_element_type=jnp.float32)

    y = att_ref[...].astype(jnp.bfloat16)                     # (R, C)
    x = x + jnp.dot(y, wpr_ref[0], preferred_element_type=jnp.float32) + sp[7:8]

    # ---- MLP ---------------------------------------------------------------
    h2 = _layernorm(x, sp[2:3], sp[3:4]).astype(jnp.bfloat16)
    h2 = jnp.dot(h2, wfc_ref[0], preferred_element_type=jnp.float32) + bfc_ref[0]
    # tanh-approx GELU runs on the EUP; small numerics delta vs PyTorch exact-erf nn.GELU().
    h2 = jax.nn.gelu(h2, approximate=True)
    h2 = jnp.dot(h2.astype(jnp.bfloat16), wfp_ref[0],
                 preferred_element_type=jnp.float32)

    acc_ref[...] = x + h2 + sp[8:9]

    @pl.when(l == n_layer - 1)
    def _():
        out_ref[...] = acc_ref[...]


def _pick_batch_block(B, T, C, vmem_limit):
    # double-buffered per-layer bf16 weights: (3 + 1 + 8) * C^2 elements
    wbytes = 2 * 12 * C * C * 2
    bb = 1
    for cand in (2, 4):                       # cap at 4 (attention core is unrolled)
        if B % cand:
            continue
        act = cand * T * (4 * C * 4 + 2 * 4 * C * 4)   # residual/attn scratch + mlp acts
        if wbytes + act <= vmem_limit // 2:
            bb = cand
    return bb


def run_blocks(x2d, mask, blk, n_head, T, BB, vmem_limit):
    BT, C = x2d.shape
    L = blk[0].shape[0]
    R = BB * T
    grid = (BT // R, L)

    def w_spec(arr):
        zeros = (0,) * (arr.ndim - 1)
        return pl.BlockSpec((1,) + tuple(arr.shape[1:]), lambda i, l: (l,) + zeros)

    in_specs = [pl.BlockSpec((R, C), lambda i, l: (i, 0)),
                pl.BlockSpec((T, T), lambda i, l: (0, 0))] + [w_spec(w) for w in blk]
    out_spec = pl.BlockSpec((R, C), lambda i, l: (i, 0))

    flops = int(BT * L * (24 * C * C + 4 * T * C))
    transc = int(BT * L * (n_head * T + 4 * C))
    nbytes = int(2 * x2d.size * 4
                 + (BT // R) * sum(int(w.size) * w.dtype.itemsize for w in blk))

    return pl.pallas_call(
        partial(_blocks_kernel, T, n_head),
        out_shape=jax.ShapeDtypeStruct((BT, C), jnp.float32),
        grid=grid,
        in_specs=in_specs,
        out_specs=out_spec,
        scratch_shapes=[pltpu.VMEM((R, C), jnp.float32),   # residual stream
                        pltpu.VMEM((R, C), jnp.float32)],  # attention output
        compiler_params=pltpu.CompilerParams(
            dimension_semantics=("parallel", "arbitrary"),
            vmem_limit_bytes=vmem_limit),
        cost_estimate=pl.CostEstimate(flops=flops, transcendentals=transc,
                                      bytes_accessed=nbytes),
    )(x2d, mask, *blk)


# ---------------------------------------------------------------------------
# Head kernel: ln_f + lm_head + BN-sigmoid gates + masking + softmax + time_pred
# Emits masked logits and a lane-dense aux slab: col0 = dur_pred, col1 = logsumexp.
# (BatchNorm batch statistics are pre-computed in JAX and passed as scale/shift.)
# ---------------------------------------------------------------------------
def _head_kernel(x_ref, lnfw_ref, lnfb_ref, wlm_ref, wtp_ref,
                 sdis_ref, hdis_ref, stim_ref, htim_ref,
                 dx_ref, dd_ref, adj_ref,
                 logits_ref, aux_ref):
    x = _layernorm(x_ref[...], lnfw_ref[...], lnfb_ref[...])
    xb = x.astype(jnp.bfloat16)

    dx = dx_ref[...]
    w_dis = jax.nn.sigmoid((dx + dd_ref[...]) * sdis_ref[...] + hdis_ref[...])
    w_tim = jax.nn.sigmoid(dx * stim_ref[...] + htim_ref[...])

    logits = jnp.dot(xb, wlm_ref[...], preferred_element_type=jnp.float32) * w_dis
    adj = adj_ref[...]
    masked = jnp.where(adj == 0.0, NEG_INF, logits)
    logits_ref[...] = masked

    m = jnp.max(masked, axis=-1, keepdims=True)
    e = jnp.exp(masked - m)
    se = jnp.sum(e, axis=-1, keepdims=True)
    lse = m + jnp.log(se)                       # per-row logsumexp for CE in glue
    probs = e / se                              # exact reciprocal on loss-bearing path
    prob_mask = jnp.where(adj == 0.0, 0.0, probs)
    delta_dis = jnp.sum(prob_mask * w_tim, axis=-1, keepdims=True)

    # time_pred weight padded to 128 lanes -> lane-dense output; column 0 is real.
    dur = jnp.dot(xb, wtp_ref[...], preferred_element_type=jnp.float32) * delta_dis
    lane = jax.lax.broadcasted_iota(jnp.int32, dur.shape, 1)
    aux_ref[...] = jnp.where(lane == 1, lse, dur)


def _row_tile(bt, V, C, vmem_limit):
    if bt % 8 != 0:
        return bt
    resident = C * V * 2 + C * 128 * 2 + 8 * V * 4 + 4 * C * 4
    per_row = 2 * (4 * V + C + 128) * 4          # double-buffered row-tiled blocks (f32)
    cap = max(8, (int(vmem_limit * 0.7) - resident) // max(per_row, 1))
    cap = min(cap, 1024)
    rt = 8
    while rt * 2 <= min(bt, cap) and bt % (rt * 2) == 0:
        rt *= 2
    return rt
    # TODO(synk): for very large vocab (C*V bf16 > VMEM budget) add a vocab-tile
    # grid axis with a two-pass / online softmax.


def run_head(x2d, head, dx2d, dd2d, adj2d, vmem_limit):
    BT, C = x2d.shape
    V = adj2d.shape[1]
    rt = _row_tile(BT, V, C, vmem_limit)
    grid = (BT // rt,)

    def row(arr):
        zeros = (0,) * (arr.ndim - 1)
        return pl.BlockSpec((rt,) + tuple(arr.shape[1:]), lambda r: (r,) + zeros)

    def full(arr):
        zeros = (0,) * arr.ndim
        return pl.BlockSpec(tuple(arr.shape), lambda r: zeros)

    lnfw, lnfb, wlm, wtp, sdis, hdis, stim, htim = head
    in_specs = [row(x2d), full(lnfw), full(lnfb), full(wlm), full(wtp),
                full(sdis), full(hdis), full(stim), full(htim),
                row(dx2d), row(dd2d), row(adj2d)]
    out_specs = (pl.BlockSpec((rt, V), lambda r: (r, 0)),
                 pl.BlockSpec((rt, 128), lambda r: (r, 0)))

    flops = int(BT * (2 * C * V + 2 * C * 128 + 10 * V))
    transc = int(BT * (3 * V + 2))
    nbytes = int(sum(int(a.size) * a.dtype.itemsize
                     for a in (x2d, dx2d, dd2d, adj2d, wlm, wtp))
                 + BT * (V + 128) * 4)

    return pl.pallas_call(
        _head_kernel,
        out_shape=(jax.ShapeDtypeStruct((BT, V), jnp.float32),
                   jax.ShapeDtypeStruct((BT, 128), jnp.float32)),
        grid=grid,
        in_specs=in_specs,
        out_specs=out_specs,
        compiler_params=pltpu.CompilerParams(
            dimension_semantics=("parallel",),
            vmem_limit_bytes=vmem_limit),
        cost_estimate=pl.CostEstimate(flops=flops, transcendentals=transc,
                                      bytes_accessed=nbytes),
    )(x2d, lnfw, lnfb, wlm, wtp, sdis, hdis, stim, htim, dx2d, dd2d, adj2d)


# ---------------------------------------------------------------------------
# Full forward (training branch: targets is not None)
# ---------------------------------------------------------------------------
def my_transformer_forward(params, idx, targets, tim_real, adj, dist_x, dist_d,
                           gnn_emb, n_head):
    B, T = idx.shape
    V = adj.shape[-1]
    vmem_limit = _vmem_limit_bytes()

    # --- embeddings (glue) ----------------------------------------------------
    tok_emb = gnn_emb[idx]                                           # (B, T, C - t_embd)
    ts = tim_real[:, :-1]                                            # (B, T)
    tim_emb = jnp.cos(ts[..., None] * params['basis_freq'][None, None, :]
                      + params['phase'][None, None, :])              # TimeEncode
    pos_emb = params['wpe'][:T]                                      # (T, C)
    x = (jnp.concatenate([tok_emb, tim_emb], axis=-1) + pos_emb[None]).astype(jnp.float32)
    C = x.shape[-1]

    # additive causal mask, built once (hoisted out of the kernel)
    causal = jnp.where(jnp.tril(jnp.ones((T, T), dtype=jnp.bool_)),
                       0.0, NEG_INF).astype(jnp.float32)

    # --- fused transformer blocks (single pallas_call, batch-blocked) ----------
    BB = _pick_batch_block(B, T, C, vmem_limit)
    x2d = run_blocks(x.reshape(B * T, C), causal, params['blocks'],
                     n_head, T, BB, vmem_limit)

    # --- BatchNorm1d training-mode batch stats, hoisted to plain JAX -----------
    lnfw, lnfb, wlm, wtp, g_dis, b_dis, g_tim, b_tim = params['head']
    dx2d = dist_x.reshape(B * T, V).astype(jnp.float32)
    dd2d = dist_d.reshape(B * T, V).astype(jnp.float32)
    adj2d = adj.reshape(B * T, V).astype(jnp.float32)

    ds = dx2d + dd2d
    mu_d = jnp.mean(ds, axis=0, keepdims=True)
    var_d = jnp.mean((ds - mu_d) ** 2, axis=0, keepdims=True)
    s_dis = g_dis * jax.lax.rsqrt(var_d + EPS_BN)
    h_dis = b_dis - mu_d * s_dis

    mu_t = jnp.mean(dx2d, axis=0, keepdims=True)
    var_t = jnp.mean((dx2d - mu_t) ** 2, axis=0, keepdims=True)
    s_tim = g_tim * jax.lax.rsqrt(var_t + EPS_BN)
    h_tim = b_tim - mu_t * s_tim

    logits2d, aux = run_head(
        x2d, (lnfw, lnfb, wlm, wtp, s_dis, h_dis, s_tim, h_tim),
        dx2d, dd2d, adj2d, vmem_limit)

    logits_masked = logits2d.reshape(B, T, V)
    dur_pred = aux[:, 0].reshape(B, T)
    lse = aux[:, 1].reshape(B, T)

    # --- losses (glue; uses the kernel's logsumexp, no second log_softmax pass) -
    valid = targets != -1
    tgt = jnp.where(valid, targets, 0)
    logit_tgt = jnp.take_along_axis(logits_masked, tgt[..., None], axis=-1)[..., 0]
    nll = lse - logit_tgt
    ce = jnp.sum(jnp.where(valid, nll, 0.0)) / jnp.sum(valid).astype(jnp.float32)

    len_mask = tim_real[:, 1:] == -1
    dur_real = tim_real[:, 1:] - tim_real[:, :-1]
    dur_real = jnp.where(len_mask, 0.0, dur_real)
    dur_pred = jnp.where(len_mask, 0.0, dur_pred)
    loss_dur = (dur_pred - dur_real) ** 2
    notmask = (~len_mask).astype(jnp.float32)
    loss = ce + jnp.sum(loss_dur * notmask) / jnp.sum(notmask)
    return logits_masked, dur_pred, loss


# ---------------------------------------------------------------------------
# Deterministic parameter init (mirrors _init_weights); weights pre-laid-out:
#   - per-layer weights stacked along a leading layer axis (bf16 matmul weights)
#   - small per-layer params packed into one (L, 9, C) array:
#       [ln1_w, ln1_b, ln2_w, ln2_b, b_q, b_k, b_v, b_attn_proj, b_mlp_proj]
#   - time_pred weight padded to a (C, 128) lane-dense slab
# ---------------------------------------------------------------------------
def init_params(key, n_embd, t_embd, n_head, n_layer, block_size, vocab):
    C, L = n_embd, n_layer
    std = 0.02
    proj_std = 0.02 / math.sqrt(2 * n_layer)
    keys = iter(jax.random.split(key, 16))

    def nrm(shape, s):
        return s * jax.random.normal(next(keys), shape, dtype=jnp.float32)

    small = jnp.zeros((L, 9, C), jnp.float32)
    small = small.at[:, 0, :].set(1.0).at[:, 2, :].set(1.0)          # ln weights = 1

    blocks = (
        small,                                                        # packed small params
        nrm((L, C, C), std).astype(jnp.bfloat16),                     # W_q^T
        nrm((L, C, C), std).astype(jnp.bfloat16),                     # W_k^T
        nrm((L, C, C), std).astype(jnp.bfloat16),                     # W_v^T
        nrm((L, C, C), proj_std).astype(jnp.bfloat16),                # attn c_proj^T
        nrm((L, C, 4 * C), std).astype(jnp.bfloat16),                 # mlp c_fc^T
        jnp.zeros((L, 1, 4 * C), jnp.float32),                        # mlp c_fc bias
        nrm((L, 4 * C, C), proj_std).astype(jnp.bfloat16),            # mlp c_proj^T
    )

    wtp = nrm((C, 1), std)
    wtp_pad = jnp.zeros((C, 128), jnp.float32).at[:, 0:1].set(wtp)

    head = (
        jnp.ones((1, C), jnp.float32), jnp.zeros((1, C), jnp.float32),          # ln_f
        nrm((C, vocab), std).astype(jnp.bfloat16),                              # lm_head W^T
        wtp_pad.astype(jnp.bfloat16),                                           # time_pred W^T padded
        jnp.ones((1, vocab), jnp.float32), jnp.zeros((1, vocab), jnp.float32),  # dist_layer BN gamma/beta
        jnp.ones((1, vocab), jnp.float32), jnp.zeros((1, vocab), jnp.float32),  # time_layer BN gamma/beta
    )

    params = dict(
        blocks=blocks, head=head,
        wpe=nrm((block_size, C), std),
        basis_freq=(1.0 / 10.0 ** jnp.linspace(0.0, 9.0, t_embd)).astype(jnp.float32),
        phase=jnp.zeros((t_embd,), jnp.float32),
    )
    # TODO(synk): DistanceGatFC.compute_gnn() (graph attention) is not ported; gnn_emb is an external input.
    gnn_emb = nrm((vocab, C - t_embd), std)
    return params, gnn_emb


# ---------------------------------------------------------------------------
if __name__ == "__main__":
    B, T = 2, 8
    block_size = T + 1
    n_embd, t_embd, n_head, n_layer = 32, 8, 4, 2
    vocab = 16

    key = jax.random.PRNGKey(0)
    kp, k1, k2, k3, k4, k5, k6 = jax.random.split(key, 7)

    params, gnn_emb = init_params(kp, n_embd, t_embd, n_head, n_layer, block_size, vocab)

    idx = jax.random.randint(k1, (B, T), 0, vocab)
    targets = jax.random.randint(k2, (B, T), 0, vocab)
    targets = targets.at[0, -1].set(-1)                               # exercise ignore_index=-1

    tim_real = jnp.cumsum(jax.random.uniform(k3, (B, T + 1), minval=0.5, maxval=2.0), axis=1)
    tim_real = tim_real.at[0, -1].set(-1.0)                           # exercise len_mask

    adj = (jax.random.uniform(k4, (B, T, vocab)) > 0.4).astype(jnp.float32)
    adj = adj.at[..., 0].set(1.0)                                     # keep every row non-empty
    tgt_safe = jnp.where(targets == -1, 0, targets)
    adj = jax.vmap(jax.vmap(lambda a, t: a.at[t].set(1.0)))(adj, tgt_safe)  # target reachable

    dist_x = jax.random.uniform(k5, (B, T, vocab), dtype=jnp.float32)
    dist_d = jax.random.uniform(k6, (B, T, vocab), dtype=jnp.float32)

    logits_masked, dur_pred, loss = my_transformer_forward(
        params, idx, targets, tim_real.astype(jnp.float32), adj, dist_x, dist_d,
        gnn_emb, n_head)

    jax.block_until_ready((logits_masked, dur_pred, loss))
    assert logits_masked.shape == (B, T, vocab)
    assert dur_pred.shape == (B, T)
    assert bool(jnp.isfinite(loss))
    print("KERNEL_OK")
</pallas_src>

<mosaic_0001>
module attributes {stable_mosaic.version = 11 : i64} {
  func.func @_blocks_kernel(%arg0: i32, %arg1: i32, %arg2: memref<16x32xf32, #tpu.memory_space<vmem>>, %arg3: memref<8x8xf32, #tpu.memory_space<vmem>>, %arg4: memref<1x9x32xf32, #tpu.memory_space<vmem>>, %arg5: memref<1x32x32xbf16, #tpu.memory_space<vmem>>, %arg6: memref<1x32x32xbf16, #tpu.memory_space<vmem>>, %arg7: memref<1x32x32xbf16, #tpu.memory_space<vmem>>, %arg8: memref<1x32x32xbf16, #tpu.memory_space<vmem>>, %arg9: memref<1x32x128xbf16, #tpu.memory_space<vmem>>, %arg10: memref<1x1x128xf32, #tpu.memory_space<vmem>>, %arg11: memref<1x128x32xbf16, #tpu.memory_space<vmem>>, %arg12: memref<16x32xf32, #tpu.memory_space<vmem>>, %arg13: memref<16x32xf32, #tpu.memory_space<vmem>>, %arg14: memref<16x32xf32, #tpu.memory_space<vmem>>) attributes {dimension_semantics = [#tpu.dimension_semantics<parallel>, #tpu.dimension_semantics<arbitrary>], iteration_bounds = array<i64: 1, 2>, scalar_prefetch = 0 : i64, scratch_operands = 2 : i64, tpu.core_type = #tpu.core_type<tc>, window_params = [{transform_indices = @transform_0, window_bounds = array<i64: 16, 32>}, {pipeline_mode = #tpu.pipeline_mode<synchronous>, transform_indices = @transform_1, window_bounds = array<i64: 8, 8>}, {transform_indices = @transform_2, window_bounds = array<i64: 1, 9, 32>}, {transform_indices = @transform_3, window_bounds = array<i64: 1, 32, 32>}, {transform_indices = @transform_4, window_bounds = array<i64: 1, 32, 32>}, {transform_indices = @transform_5, window_bounds = array<i64: 1, 32, 32>}, {transform_indices = @transform_6, window_bounds = array<i64: 1, 32, 32>}, {transform_indices = @transform_7, window_bounds = array<i64: 1, 32, 128>}, {transform_indices = @transform_8, window_bounds = array<i64: 1, 1, 128>}, {transform_indices = @transform_9, window_bounds = array<i64: 1, 128, 32>}, {transform_indices = @transform_10, window_bounds = array<i64: 16, 32>}]} {
    %c0_i32 = arith.constant 0 : i32
    %0 = arith.cmpi eq, %arg1, %c0_i32 : i32
    %1 = arith.extui %0 : i1 to i32
    %c0_i32_0 = arith.constant 0 : i32
    %2 = arith.cmpi ne, %1, %c0_i32_0 : i32
    scf.if %2 {
      %c0_105 = arith.constant 0 : index
      %c0_106 = arith.constant 0 : index
      %287 = vector.load %arg2[%c0_105, %c0_106] : memref<16x32xf32, #tpu.memory_space<vmem>>, vector<16x32xf32>
      %c0_107 = arith.constant 0 : index
      %c0_108 = arith.constant 0 : index
      %288 = vector.load %arg13[%c0_107, %c0_108] : memref<16x32xf32, #tpu.memory_space<vmem>>, vector<16x32xf32>
      tpu.vector_store %arg13[%c0_107, %c0_108], %287 {strides = array<i32>} : memref<16x32xf32, #tpu.memory_space<vmem>>, vector<16x32xf32>,
    } else {
    }
    %c0 = arith.constant 0 : index
    %c0_1 = arith.constant 0 : index
    %3 = vector.load %arg13[%c0, %c0_1] : memref<16x32xf32, #tpu.memory_space<vmem>>, vector<16x32xf32>
    %c0_2 = arith.constant 0 : index
    %c0_3 = arith.constant 0 : index
    %c0_4 = arith.constant 0 : index
    %4 = vector.load %arg4[%c0_2, %c0_3, %c0_4] : memref<1x9x32xf32, #tpu.memory_space<vmem>>, vector<1x9x32xf32>
    %5 = vector.shape_cast %4 : vector<1x9x32xf32> to vector<9x32xf32>
    %6 = vector.extract_strided_slice %5 {offsets = [0, 0], sizes = [1, 32], strides = [1, 1]} : vector<9x32xf32> to vector<1x32xf32>
    %7 = vector.extract_strided_slice %5 {offsets = [1, 0], sizes = [1, 32], strides = [1, 1]} : vector<9x32xf32> to vector<1x32xf32>
    %cst = arith.constant dense<0.000000e+00> : vector<16xf32>
    %8 = vector.multi_reduction <add>, %3, %cst [1] : vector<16x32xf32> to vector<16xf32>
    %9 = vector.shape_cast %8 : vector<16xf32> to vector<16x1xf32>
    %cst_5 = arith.constant 3.200000e+01 : f32
    %10 = vector.broadcast %cst_5 : f32 to vector<16x1xf32>
    %11 = arith.divf %9, %10 : vector<16x1xf32>
    %12 = vector.broadcast %11 : vector<16x1xf32> to vector<16x32xf32>
    %13 = arith.subf %3, %12 : vector<16x32xf32>
    %14 = arith.mulf %13, %13 : vector<16x32xf32>
    %cst_6 = arith.constant dense<0.000000e+00> : vector<16xf32>
    %15 = vector.multi_reduction <add>, %14, %cst_6 [1] : vector<16x32xf32> to vector<16xf32>
    %16 = vector.shape_cast %15 : vector<16xf32> to vector<16x1xf32>
    %cst_7 = arith.constant 3.200000e+01 : f32
    %17 = vector.broadcast %cst_7 : f32 to vector<16x1xf32>
    %18 = arith.divf %16, %17 : vector<16x1xf32>
    %19 = vector.broadcast %11 : vector<16x1xf32> to vector<16x32xf32>
    %20 = arith.subf %3, %19 : vector<16x32xf32>
    %cst_8 = arith.constant 9.99999974E-6 : f32
    %21 = vector.broadcast %cst_8 : f32 to vector<16x1xf32>
    %22 = arith.addf %18, %21 : vector<16x1xf32>
    %23 = math.rsqrt %22 : vector<16x1xf32>
    %24 = vector.broadcast %23 : vector<16x1xf32> to vector<16x32xf32>
    %25 = arith.mulf %20, %24 : vector<16x32xf32>
    %26 = vector.broadcast %6 : vector<1x32xf32> to vector<16x32xf32>
    %27 = arith.mulf %25, %26 : vector<16x32xf32>
    %28 = vector.broadcast %7 : vector<1x32xf32> to vector<16x32xf32>
    %29 = arith.addf %27, %28 : vector<16x32xf32>
    %30 = arith.truncf %29 : vector<16x32xf32> to vector<16x32xbf16>
    %c0_9 = arith.constant 0 : index
    %c0_10 = arith.constant 0 : index
    %c0_11 = arith.constant 0 : index
    %31 = vector.load %arg5[%c0_9, %c0_10, %c0_11] : memref<1x32x32xbf16, #tpu.memory_space<vmem>>, vector<1x32x32xbf16>
    %32 = vector.shape_cast %31 : vector<1x32x32xbf16> to vector<32x32xbf16>
    %cst_12 = arith.constant dense<0.000000e+00> : vector<16x32xf32>
    %33 = tpu.matmul %30, %32, %cst_12 {dimension_numbers = #tpu.dot_dimension_numbers<[1], [0], [0], [1], [0, 0, 1, 1], [], []>} : vector<16x32xbf16>, vector<32x32xbf16>, vector<16x32xf32> -> vector<16x32xf32>
    %34 = vector.extract_strided_slice %5 {offsets = [4, 0], sizes = [1, 32], strides = [1, 1]} : vector<9x32xf32> to vector<1x32xf32>
    %35 = vector.broadcast %34 : vector<1x32xf32> to vector<16x32xf32>
    %36 = arith.addf %33, %35 : vector<16x32xf32>
    %c0_13 = arith.constant 0 : index
    %c0_14 = arith.constant 0 : index
    %c0_15 = arith.constant 0 : index
    %37 = vector.load %arg6[%c0_13, %c0_14, %c0_15] : memref<1x32x32xbf16, #tpu.memory_space<vmem>>, vector<1x32x32xbf16>
    %38 = vector.shape_cast %37 : vector<1x32x32xbf16> to vector<32x32xbf16>
    %cst_16 = arith.constant dense<0.000000e+00> : vector<16x32xf32>
    %39 = tpu.matmul %30, %38, %cst_16 {dimension_numbers = #tpu.dot_dimension_numbers<[1], [0], [0], [1], [0, 0, 1, 1], [], []>} : vector<16x32xbf16>, vector<32x32xbf16>, vector<16x32xf32> -> vector<16x32xf32>
    %40 = vector.extract_strided_slice %5 {offsets = [5, 0], sizes = [1, 32], strides = [1, 1]} : vector<9x32xf32> to vector<1x32xf32>
    %41 = vector.broadcast %40 : vector<1x32xf32> to vector<16x32xf32>
    %42 = arith.addf %39, %41 : vector<16x32xf32>
    %c0_17 = arith.constant 0 : index
    %c0_18 = arith.constant 0 : index
    %c0_19 = arith.constant 0 : index
    %43 = vector.load %arg7[%c0_17, %c0_18, %c0_19] : memref<1x32x32xbf16, #tpu.memory_space<vmem>>, vector<1x32x32xbf16>
    %44 = vector.shape_cast %43 : vector<1x32x32xbf16> to vector<32x32xbf16>
    %cst_20 = arith.constant dense<0.000000e+00> : vector<16x32xf32>
    %45 = tpu.matmul %30, %44, %cst_20 {dimension_numbers = #tpu.dot_dimension_numbers<[1], [0], [0], [1], [0, 0, 1, 1], [], []>} : vector<16x32xbf16>, vector<32x32xbf16>, vector<16x32xf32> -> vector<16x32xf32>
    %46 = vector.extract_strided_slice %5 {offsets = [6, 0], sizes = [1, 32], strides = [1, 1]} : vector<9x32xf32> to vector<1x32xf32>
    %47 = vector.broadcast %46 : vector<1x32xf32> to vector<16x32xf32>
    %48 = arith.addf %45, %47 : vector<16x32xf32>
    %49 = arith.truncf %36 : vector<16x32xf32> to vector<16x32xbf16>
    %50 = arith.truncf %42 : vector<16x32xf32> to vector<16x32xbf16>
    %51 = arith.truncf %48 : vector<16x32xf32> to vector<16x32xbf16>
    %c0_21 = arith.constant 0 : index
    %c0_22 = arith.constant 0 : index
    %52 = vector.load %arg3[%c0_21, %c0_22] : memref<8x8xf32, #tpu.memory_space<vmem>>, vector<8x8xf32>
    %53 = vector.extract_strided_slice %49 {offsets = [0, 0], sizes = [8, 8], strides = [1, 1]} : vector<16x32xbf16> to vector<8x8xbf16>
    %54 = vector.extract_strided_slice %50 {offsets = [0, 0], sizes = [8, 8], strides = [1, 1]} : vector<16x32xbf16> to vector<8x8xbf16>
    %55 = vector.extract_strided_slice %51 {offsets = [0, 0], sizes = [8, 8], strides = [1, 1]} : vector<16x32xbf16> to vector<8x8xbf16>
    %56 = tpu.transpose %54, [1, 0] : vector<8x8xbf16> -> vector<8x8xbf16>
    %cst_23 = arith.constant dense<0.000000e+00> : vector<8x8xf32>
    %57 = tpu.matmul %53, %56, %cst_23 {dimension_numbers = #tpu.dot_dimension_numbers<[1], [0], [0], [1], [0, 0, 1, 1], [], []>} : vector<8x8xbf16>, vector<8x8xbf16>, vector<8x8xf32> -> vector<8x8xf32>
    %cst_24 = arith.constant 0.353553385 : f32
    %58 = vector.broadcast %cst_24 : f32 to vector<8x8xf32>
    %59 = arith.mulf %57, %58 : vector<8x8xf32>
    %60 = arith.addf %59, %52 : vector<8x8xf32>
    %cst_25 = arith.constant dense<0xFF800000> : vector<8xf32>
    %61 = vector.multi_reduction <maximumf>, %60, %cst_25 [1] : vector<8x8xf32> to vector<8xf32>
    %62 = vector.shape_cast %61 : vector<8xf32> to vector<8x1xf32>
    %63 = vector.broadcast %62 : vector<8x1xf32> to vector<8x8xf32>
    %64 = arith.subf %60, %63 : vector<8x8xf32>
    %65 = math.exp %64 : vector<8x8xf32>
    %cst_26 = arith.constant dense<0.000000e+00> : vector<8xf32>
    %66 = vector.multi_reduction <add>, %65, %cst_26 [1] : vector<8x8xf32> to vector<8xf32>
    %67 = vector.shape_cast %66 : vector<8xf32> to vector<8x1xf32>
    %68 = tpu.reciprocal %67 {approx = true} : vector<8x1xf32> -> vector<8x1xf32>
    %69 = vector.broadcast %68 : vector<8x1xf32> to vector<8x8xf32>
    %70 = arith.mulf %65, %69 : vector<8x8xf32>
    %71 = arith.truncf %70 : vector<8x8xf32> to vector<8x8xbf16>
    %cst_27 = arith.constant dense<0.000000e+00> : vector<8x8xf32>
    %72 = tpu.matmul %71, %55, %cst_27 {dimension_numbers = #tpu.dot_dimension_numbers<[1], [0], [0], [1], [0, 0, 1, 1], [], []>} : vector<8x8xbf16>, vector<8x8xbf16>, vector<8x8xf32> -> vector<8x8xf32>
    %c0_28 = arith.constant 0 : index
    %c0_29 = arith.constant 0 : index
    %73 = vector.load %arg14[%c0_28, %c0_29] : memref<16x32xf32, #tpu.memory_space<vmem>>, vector<8x8xf32>
    tpu.vector_store %arg14[%c0_28, %c0_29], %72 {strides = array<i32>} : memref<16x32xf32, #tpu.memory_space<vmem>>, vector<8x8xf32>,
    %74 = vector.extract_strided_slice %49 {offsets = [0, 8], sizes = [8, 8], strides = [1, 1]} : vector<16x32xbf16> to vector<8x8xbf16>
    %75 = vector.extract_strided_slice %50 {offsets = [0, 8], sizes = [8, 8], strides = [1, 1]} : vector<16x32xbf16> to vector<8x8xbf16>
    %76 = vector.extract_strided_slice %51 {offsets = [0, 8], sizes = [8, 8], strides = [1, 1]} : vector<16x32xbf16> to vector<8x8xbf16>
    %77 = tpu.transpose %75, [1, 0] : vector<8x8xbf16> -> vector<8x8xbf16>
    %cst_30 = arith.constant dense<0.000000e+00> : vector<8x8xf32>
    %78 = tpu.matmul %74, %77, %cst_30 {dimension_numbers = #tpu.dot_dimension_numbers<[1], [0], [0], [1], [0, 0, 1, 1], [], []>} : vector<8x8xbf16>, vector<8x8xbf16>, vector<8x8xf32> -> vector<8x8xf32>
    %cst_31 = arith.constant 0.353553385 : f32
    %79 = vector.broadcast %cst_31 : f32 to vector<8x8xf32>
    %80 = arith.mulf %78, %79 : vector<8x8xf32>
    %81 = arith.addf %80, %52 : vector<8x8xf32>
    %cst_32 = arith.constant dense<0xFF800000> : vector<8xf32>
    %82 = vector.multi_reduction <maximumf>, %81, %cst_32 [1] : vector<8x8xf32> to vector<8xf32>
    %83 = vector.shape_cast %82 : vector<8xf32> to vector<8x1xf32>
    %84 = vector.broadcast %83 : vector<8x1xf32> to vector<8x8xf32>
    %85 = arith.subf %81, %84 : vector<8x8xf32>
    %86 = math.exp %85 : vector<8x8xf32>
    %cst_33 = arith.constant dense<0.000000e+00> : vector<8xf32>
    %87 = vector.multi_reduction <add>, %86, %cst_33 [1] : vector<8x8xf32> to vector<8xf32>
    %88 = vector.shape_cast %87 : vector<8xf32> to vector<8x1xf32>
    %89 = tpu.reciprocal %88 {approx = true} : vector<8x1xf32> -> vector<8x1xf32>
    %90 = vector.broadcast %89 : vector<8x1xf32> to vector<8x8xf32>
    %91 = arith.mulf %86, %90 : vector<8x8xf32>
    %92 = arith.truncf %91 : vector<8x8xf32> to vector<8x8xbf16>
    %cst_34 = arith.constant dense<0.000000e+00> : vector<8x8xf32>
    %93 = tpu.matmul %92, %76, %cst_34 {dimension_numbers = #tpu.dot_dimension_numbers<[1], [0], [0], [1], [0, 0, 1, 1], [], []>} : vector<8x8xbf16>, vector<8x8xbf16>, vector<8x8xf32> -> vector<8x8xf32>
    %c0_35 = arith.constant 0 : index
    %c8 = arith.constant 8 : index
    %94 = vector.load %arg14[%c0_35, %c8] : memref<16x32xf32, #tpu.memory_space<vmem>>, vector<8x8xf32>
    tpu.vector_store %arg14[%c0_35, %c8], %93 {strides = array<i32>} : memref<16x32xf32, #tpu.memory_space<vmem>>, vector<8x8xf32>,
    %95 = vector.extract_strided_slice %49 {offsets = [0, 16], sizes = [8, 8], strides = [1, 1]} : vector<16x32xbf16> to vector<8x8xbf16>
    %96 = vector.extract_strided_slice %50 {offsets = [0, 16], sizes = [8, 8], strides = [1, 1]} : vector<16x32xbf16> to vector<8x8xbf16>
    %97 = vector.extract_strided_slice %51 {offsets = [0, 16], sizes = [8, 8], strides = [1, 1]} : vector<16x32xbf16> to vector<8x8xbf16>
    %98 = tpu.transpose %96, [1, 0] : vector<8x8xbf16> -> vector<8x8xbf16>
    %cst_36 = arith.constant dense<0.000000e+00> : vector<8x8xf32>
    %99 = tpu.matmul %95, %98, %cst_36 {dimension_numbers = #tpu.dot_dimension_numbers<[1], [0], [0], [1], [0, 0, 1, 1], [], []>} : vector<8x8xbf16>, vector<8x8xbf16>, vector<8x8xf32> -> vector<8x8xf32>
    %cst_37 = arith.constant 0.353553385 : f32
    %100 = vector.broadcast %cst_37 : f32 to vector<8x8xf32>
    %101 = arith.mulf %99, %100 : vector<8x8xf32>
    %102 = arith.addf %101, %52 : vector<8x8xf32>
    %cst_38 = arith.constant dense<0xFF800000> : vector<8xf32>
    %103 = vector.multi_reduction <maximumf>, %102, %cst_38 [1] : vector<8x8xf32> to vector<8xf32>
    %104 = vector.shape_cast %103 : vector<8xf32> to vector<8x1xf32>
    %105 = vector.broadcast %104 : vector<8x1xf32> to vector<8x8xf32>
    %106 = arith.subf %102, %105 : vector<8x8xf32>
    %107 = math.exp %106 : vector<8x8xf32>
    %cst_39 = arith.constant dense<0.000000e+00> : vector<8xf32>
    %108 = vector.multi_reduction <add>, %107, %cst_39 [1] : vector<8x8xf32> to vector<8xf32>
    %109 = vector.shape_cast %108 : vector<8xf32> to vector<8x1xf32>
    %110 = tpu.reciprocal %109 {approx = true} : vector<8x1xf32> -> vector<8x1xf32>
    %111 = vector.broadcast %110 : vector<8x1xf32> to vector<8x8xf32>
    %112 = arith.mulf %107, %111 : vector<8x8xf32>
    %113 = arith.truncf %112 : vector<8x8xf32> to vector<8x8xbf16>
    %cst_40 = arith.constant dense<0.000000e+00> : vector<8x8xf32>
    %114 = tpu.matmul %113, %97, %cst_40 {dimension_numbers = #tpu.dot_dimension_numbers<[1], [0], [0], [1], [0, 0, 1, 1], [], []>} : vector<8x8xbf16>, vector<8x8xbf16>, vector<8x8xf32> -> vector<8x8xf32>
    %c0_41 = arith.constant 0 : index
    %c16 = arith.constant 16 : index
    %115 = vector.load %arg14[%c0_41, %c16] : memref<16x32xf32, #tpu.memory_space<vmem>>, vector<8x8xf32>
    tpu.vector_store %arg14[%c0_41, %c16], %114 {strides = array<i32>} : memref<16x32xf32, #tpu.memory_space<vmem>>, vector<8x8xf32>,
    %116 = vector.extract_strided_slice %49 {offsets = [0, 24], sizes = [8, 8], strides = [1, 1]} : vector<16x32xbf16> to vector<8x8xbf16>
    %117 = vector.extract_strided_slice %50 {offsets = [0, 24], sizes = [8, 8], strides = [1, 1]} : vector<16x32xbf16> to vector<8x8xbf16>
    %118 = vector.extract_strided_slice %51 {offsets = [0, 24], sizes = [8, 8], strides = [1, 1]} : vector<16x32xbf16> to vector<8x8xbf16>
    %119 = tpu.transpose %117, [1, 0] : vector<8x8xbf16> -> vector<8x8xbf16>
    %cst_42 = arith.constant dense<0.000000e+00> : vector<8x8xf32>
    %120 = tpu.matmul %116, %119, %cst_42 {dimension_numbers = #tpu.dot_dimension_numbers<[1], [0], [0], [1], [0, 0, 1, 1], [], []>} : vector<8x8xbf16>, vector<8x8xbf16>, vector<8x8xf32> -> vector<8x8xf32>
    %cst_43 = arith.constant 0.353553385 : f32
    %121 = vector.broadcast %cst_43 : f32 to vector<8x8xf32>
    %122 = arith.mulf %120, %121 : vector<8x8xf32>
    %123 = arith.addf %122, %52 : vector<8x8xf32>
    %cst_44 = arith.constant dense<0xFF800000> : vector<8xf32>
    %124 = vector.multi_reduction <maximumf>, %123, %cst_44 [1] : vector<8x8xf32> to vector<8xf32>
    %125 = vector.shape_cast %124 : vector<8xf32> to vector<8x1xf32>
    %126 = vector.broadcast %125 : vector<8x1xf32> to vector<8x8xf32>
    %127 = arith.subf %123, %126 : vector<8x8xf32>
    %128 = math.exp %127 : vector<8x8xf32>
    %cst_45 = arith.constant dense<0.000000e+00> : vector<8xf32>
    %129 = vector.multi_reduction <add>, %128, %cst_45 [1] : vector<8x8xf32> to vector<8xf32>
    %130 = vector.shape_cast %129 : vector<8xf32> to vector<8x1xf32>
    %131 = tpu.reciprocal %130 {approx = true} : vector<8x1xf32> -> vector<8x1xf32>
    %132 = vector.broadcast %131 : vector<8x1xf32> to vector<8x8xf32>
    %133 = arith.mulf %128, %132 : vector<8x8xf32>
    %134 = arith.truncf %133 : vector<8x8xf32> to vector<8x8xbf16>
    %cst_46 = arith.constant dense<0.000000e+00> : vector<8x8xf32>
    %135 = tpu.matmul %134, %118, %cst_46 {dimension_numbers = #tpu.dot_dimension_numbers<[1], [0], [0], [1], [0, 0, 1, 1], [], []>} : vector<8x8xbf16>, vector<8x8xbf16>, vector<8x8xf32> -> vector<8x8xf32>
    %c0_47 = arith.constant 0 : index
    %c24 = arith.constant 24 : index
    %136 = vector.load %arg14[%c0_47, %c24] : memref<16x32xf32, #tpu.memory_space<vmem>>, vector<8x8xf32>
    tpu.vector_store %arg14[%c0_47, %c24], %135 {strides = array<i32>} : memref<16x32xf32, #tpu.memory_space<vmem>>, vector<8x8xf32>,
    %137 = vector.extract_strided_slice %49 {offsets = [8, 0], sizes = [8, 8], strides = [1, 1]} : vector<16x32xbf16> to vector<8x8xbf16>
    %138 = vector.extract_strided_slice %50 {offsets = [8, 0], sizes = [8, 8], strides = [1, 1]} : vector<16x32xbf16> to vector<8x8xbf16>
    %139 = vector.extract_strided_slice %51 {offsets = [8, 0], sizes = [8, 8], strides = [1, 1]} : vector<16x32xbf16> to vector<8x8xbf16>
    %140 = tpu.transpose %138, [1, 0] : vector<8x8xbf16> -> vector<8x8xbf16>
    %cst_48 = arith.constant dense<0.000000e+00> : vector<8x8xf32>
    %141 = tpu.matmul %137, %140, %cst_48 {dimension_numbers = #tpu.dot_dimension_numbers<[1], [0], [0], [1], [0, 0, 1, 1], [], []>} : vector<8x8xbf16>, vector<8x8xbf16>, vector<8x8xf32> -> vector<8x8xf32>
    %cst_49 = arith.constant 0.353553385 : f32
    %142 = vector.broadcast %cst_49 : f32 to vector<8x8xf32>
    %143 = arith.mulf %141, %142 : vector<8x8xf32>
    %144 = arith.addf %143, %52 : vector<8x8xf32>
    %cst_50 = arith.constant dense<0xFF800000> : vector<8xf32>
    %145 = vector.multi_reduction <maximumf>, %144, %cst_50 [1] : vector<8x8xf32> to vector<8xf32>
    %146 = vector.shape_cast %145 : vector<8xf32> to vector<8x1xf32>
    %147 = vector.broadcast %146 : vector<8x1xf32> to vector<8x8xf32>
    %148 = arith.subf %144, %147 : vector<8x8xf32>
    %149 = math.exp %148 : vector<8x8xf32>
    %cst_51 = arith.constant dense<0.000000e+00> : vector<8xf32>
    %150 = vector.multi_reduction <add>, %149, %cst_51 [1] : vector<8x8xf32> to vector<8xf32>
    %151 = vector.shape_cast %150 : vector<8xf32> to vector<8x1xf32>
    %152 = tpu.reciprocal %151 {approx = true} : vector<8x1xf32> -> vector<8x1xf32>
    %153 = vector.broadcast %152 : vector<8x1xf32> to vector<8x8xf32>
    %154 = arith.mulf %149, %153 : vector<8x8xf32>
    %155 = arith.truncf %154 : vector<8x8xf32> to vector<8x8xbf16>
    %cst_52 = arith.constant dense<0.000000e+00> : vector<8x8xf32>
    %156 = tpu.matmul %155, %139, %cst_52 {dimension_numbers = #tpu.dot_dimension_numbers<[1], [0], [0], [1], [0, 0, 1, 1], [], []>} : vector<8x8xbf16>, vector<8x8xbf16>, vector<8x8xf32> -> vector<8x8xf32>
    %c8_53 = arith.constant 8 : index
    %c0_54 = arith.constant 0 : index
    %157 = vector.load %arg14[%c8_53, %c0_54] : memref<16x32xf32, #tpu.memory_space<vmem>>, vector<8x8xf32>
    tpu.vector_store %arg14[%c8_53, %c0_54], %156 {strides = array<i32>} : memref<16x32xf32, #tpu.memory_space<vmem>>, vector<8x8xf32>,
    %158 = vector.extract_strided_slice %49 {offsets = [8, 8], sizes = [8, 8], strides = [1, 1]} : vector<16x32xbf16> to vector<8x8xbf16>
    %159 = vector.extract_strided_slice %50 {offsets = [8, 8], sizes = [8, 8], strides = [1, 1]} : vector<16x32xbf16> to vector<8x8xbf16>
    %160 = vector.extract_strided_slice %51 {offsets = [8, 8], sizes = [8, 8], strides = [1, 1]} : vector<16x32xbf16> to vector<8x8xbf16>
    %161 = tpu.transpose %159, [1, 0] : vector<8x8xbf16> -> vector<8x8xbf16>
    %cst_55 = arith.constant dense<0.000000e+00> : vector<8x8xf32>
    %162 = tpu.matmul %158, %161, %cst_55 {dimension_numbers = #tpu.dot_dimension_numbers<[1], [0], [0], [1], [0, 0, 1, 1], [], []>} : vector<8x8xbf16>, vector<8x8xbf16>, vector<8x8xf32> -> vector<8x8xf32>
    %cst_56 = arith.constant 0.353553385 : f32
    %163 = vector.broadcast %cst_56 : f32 to vector<8x8xf32>
    %164 = arith.mulf %162, %163 : vector<8x8xf32>
    %165 = arith.addf %164, %52 : vector<8x8xf32>
    %cst_57 = arith.constant dense<0xFF800000> : vector<8xf32>
    %166 = vector.multi_reduction <maximumf>, %165, %cst_57 [1] : vector<8x8xf32> to vector<8xf32>
    %167 = vector.shape_cast %166 : vector<8xf32> to vector<8x1xf32>
    %168 = vector.broadcast %167 : vector<8x1xf32> to vector<8x8xf32>
    %169 = arith.subf %165, %168 : vector<8x8xf32>
    %170 = math.exp %169 : vector<8x8xf32>
    %cst_58 = arith.constant dense<0.000000e+00> : vector<8xf32>
    %171 = vector.multi_reduction <add>, %170, %cst_58 [1] : vector<8x8xf32> to vector<8xf32>
    %172 = vector.shape_cast %171 : vector<8xf32> to vector<8x1xf32>
    %173 = tpu.reciprocal %172 {approx = true} : vector<8x1xf32> -> vector<8x1xf32>
    %174 = vector.broadcast %173 : vector<8x1xf32> to vector<8x8xf32>
    %175 = arith.mulf %170, %174 : vector<8x8xf32>
    %176 = arith.truncf %175 : vector<8x8xf32> to vector<8x8xbf16>
    %cst_59 = arith.constant dense<0.000000e+00> : vector<8x8xf32>
    %177 = tpu.matmul %176, %160, %cst_59 {dimension_numbers = #tpu.dot_dimension_numbers<[1], [0], [0], [1], [0, 0, 1, 1], [], []>} : vector<8x8xbf16>, vector<8x8xbf16>, vector<8x8xf32> -> vector<8x8xf32>
    %c8_60 = arith.constant 8 : index
    %c8_61 = arith.constant 8 : index
    %178 = vector.load %arg14[%c8_60, %c8_61] : memref<16x32xf32, #tpu.memory_space<vmem>>, vector<8x8xf32>
    tpu.vector_store %arg14[%c8_60, %c8_61], %177 {strides = array<i32>} : memref<16x32xf32, #tpu.memory_space<vmem>>, vector<8x8xf32>,
    %179 = vector.extract_strided_slice %49 {offsets = [8, 16], sizes = [8, 8], strides = [1, 1]} : vector<16x32xbf16> to vector<8x8xbf16>
    %180 = vector.extract_strided_slice %50 {offsets = [8, 16], sizes = [8, 8], strides = [1, 1]} : vector<16x32xbf16> to vector<8x8xbf16>
    %181 = vector.extract_strided_slice %51 {offsets = [8, 16], sizes = [8, 8], strides = [1, 1]} : vector<16x32xbf16> to vector<8x8xbf16>
    %182 = tpu.transpose %180, [1, 0] : vector<8x8xbf16> -> vector<8x8xbf16>
    %cst_62 = arith.constant dense<0.000000e+00> : vector<8x8xf32>
    %183 = tpu.matmul %179, %182, %cst_62 {dimension_numbers = #tpu.dot_dimension_numbers<[1], [0], [0], [1], [0, 0, 1, 1], [], []>} : vector<8x8xbf16>, vector<8x8xbf16>, vector<8x8xf32> -> vector<8x8xf32>
    %cst_63 = arith.constant 0.353553385 : f32
    %184 = vector.broadcast %cst_63 : f32 to vector<8x8xf32>
    %185 = arith.mulf %183, %184 : vector<8x8xf32>
    %186 = arith.addf %185, %52 : vector<8x8xf32>
    %cst_64 = arith.constant dense<0xFF800000> : vector<8xf32>
    %187 = vector.multi_reduction <maximumf>, %186, %cst_64 [1] : vector<8x8xf32> to vector<8xf32>
    %188 = vector.shape_cast %187 : vector<8xf32> to vector<8x1xf32>
    %189 = vector.broadcast %188 : vector<8x1xf32> to vector<8x8xf32>
    %190 = arith.subf %186, %189 : vector<8x8xf32>
    %191 = math.exp %190 : vector<8x8xf32>
    %cst_65 = arith.constant dense<0.000000e+00> : vector<8xf32>
    %192 = vector.multi_reduction <add>, %191, %cst_65 [1] : vector<8x8xf32> to vector<8xf32>
    %193 = vector.shape_cast %192 : vector<8xf32> to vector<8x1xf32>
    %194 = tpu.reciprocal %193 {approx = true} : vector<8x1xf32> -> vector<8x1xf32>
    %195 = vector.broadcast %194 : vector<8x1xf32> to vector<8x8xf32>
    %196 = arith.mulf %191, %195 : vector<8x8xf32>
    %197 = arith.truncf %196 : vector<8x8xf32> to vector<8x8xbf16>
    %cst_66 = arith.constant dense<0.000000e+00> : vector<8x8xf32>
    %198 = tpu.matmul %197, %181, %cst_66 {dimension_numbers = #tpu.dot_dimension_numbers<[1], [0], [0], [1], [0, 0, 1, 1], [], []>} : vector<8x8xbf16>, vector<8x8xbf16>, vector<8x8xf32> -> vector<8x8xf32>
    %c8_67 = arith.constant 8 : index
    %c16_68 = arith.constant 16 : index
    %199 = vector.load %arg14[%c8_67, %c16_68] : memref<16x32xf32, #tpu.memory_space<vmem>>, vector<8x8xf32>
    tpu.vector_store %arg14[%c8_67, %c16_68], %198 {strides = array<i32>} : memref<16x32xf32, #tpu.memory_space<vmem>>, vector<8x8xf32>,
    %200 = vector.extract_strided_slice %49 {offsets = [8, 24], sizes = [8, 8], strides = [1, 1]} : vector<16x32xbf16> to vector<8x8xbf16>
    %201 = vector.extract_strided_slice %50 {offsets = [8, 24], sizes = [8, 8], strides = [1, 1]} : vector<16x32xbf16> to vector<8x8xbf16>
    %202 = vector.extract_strided_slice %51 {offsets = [8, 24], sizes = [8, 8], strides = [1, 1]} : vector<16x32xbf16> to vector<8x8xbf16>
    %203 = tpu.transpose %201, [1, 0] : vector<8x8xbf16> -> vector<8x8xbf16>
    %cst_69 = arith.constant dense<0.000000e+00> : vector<8x8xf32>
    %204 = tpu.matmul %200, %203, %cst_69 {dimension_numbers = #tpu.dot_dimension_numbers<[1], [0], [0], [1], [0, 0, 1, 1], [], []>} : vector<8x8xbf16>, vector<8x8xbf16>, vector<8x8xf32> -> vector<8x8xf32>
    %cst_70 = arith.constant 0.353553385 : f32
    %205 = vector.broadcast %cst_70 : f32 to vector<8x8xf32>
    %206 = arith.mulf %204, %205 : vector<8x8xf32>
    %207 = arith.addf %206, %52 : vector<8x8xf32>
    %cst_71 = arith.constant dense<0xFF800000> : vector<8xf32>
    %208 = vector.multi_reduction <maximumf>, %207, %cst_71 [1] : vector<8x8xf32> to vector<8xf32>
    %209 = vector.shape_cast %208 : vector<8xf32> to vector<8x1xf32>
    %210 = vector.broadcast %209 : vector<8x1xf32> to vector<8x8xf32>
    %211 = arith.subf %207, %210 : vector<8x8xf32>
    %212 = math.exp %211 : vector<8x8xf32>
    %cst_72 = arith.constant dense<0.000000e+00> : vector<8xf32>
    %213 = vector.multi_reduction <add>, %212, %cst_72 [1] : vector<8x8xf32> to vector<8xf32>
    %214 = vector.shape_cast %213 : vector<8xf32> to vector<8x1xf32>
    %215 = tpu.reciprocal %214 {approx = true} : vector<8x1xf32> -> vector<8x1xf32>
    %216 = vector.broadcast %215 : vector<8x1xf32> to vector<8x8xf32>
    %217 = arith.mulf %212, %216 : vector<8x8xf32>
    %218 = arith.truncf %217 : vector<8x8xf32> to vector<8x8xbf16>
    %cst_73 = arith.constant dense<0.000000e+00> : vector<8x8xf32>
    %219 = tpu.matmul %218, %202, %cst_73 {dimension_numbers = #tpu.dot_dimension_numbers<[1], [0], [0], [1], [0, 0, 1, 1], [], []>} : vector<8x8xbf16>, vector<8x8xbf16>, vector<8x8xf32> -> vector<8x8xf32>
    %c8_74 = arith.constant 8 : index
    %c24_75 = arith.constant 24 : index
    %220 = vector.load %arg14[%c8_74, %c24_75] : memref<16x32xf32, #tpu.memory_space<vmem>>, vector<8x8xf32>
    tpu.vector_store %arg14[%c8_74, %c24_75], %219 {strides = array<i32>} : memref<16x32xf32, #tpu.memory_space<vmem>>, vector<8x8xf32>,
    %c0_76 = arith.constant 0 : index
    %c0_77 = arith.constant 0 : index
    %221 = vector.load %arg14[%c0_76, %c0_77] : memref<16x32xf32, #tpu.memory_space<vmem>>, vector<16x32xf32>
    %222 = arith.truncf %221 : vector<16x32xf32> to vector<16x32xbf16>
    %c0_78 = arith.constant 0 : index
    %c0_79 = arith.constant 0 : index
    %c0_80 = arith.constant 0 : index
    %223 = vector.load %arg8[%c0_78, %c0_79, %c0_80] : memref<1x32x32xbf16, #tpu.memory_space<vmem>>, vector<1x32x32xbf16>
    %224 = vector.shape_cast %223 : vector<1x32x32xbf16> to vector<32x32xbf16>
    %cst_81 = arith.constant dense<0.000000e+00> : vector<16x32xf32>
    %225 = tpu.matmul %222, %224, %cst_81 {dimension_numbers = #tpu.dot_dimension_numbers<[1], [0], [0], [1], [0, 0, 1, 1], [], []>} : vector<16x32xbf16>, vector<32x32xbf16>, vector<16x32xf32> -> vector<16x32xf32>
    %226 = arith.addf %3, %225 : vector<16x32xf32>
    %227 = vector.extract_strided_slice %5 {offsets = [7, 0], sizes = [1, 32], strides = [1, 1]} : vector<9x32xf32> to vector<1x32xf32>
    %228 = vector.broadcast %227 : vector<1x32xf32> to vector<16x32xf32>
    %229 = arith.addf %226, %228 : vector<16x32xf32>
    %230 = vector.extract_strided_slice %5 {offsets = [2, 0], sizes = [1, 32], strides = [1, 1]} : vector<9x32xf32> to vector<1x32xf32>
    %231 = vector.extract_strided_slice %5 {offsets = [3, 0], sizes = [1, 32], strides = [1, 1]} : vector<9x32xf32> to vector<1x32xf32>
    %cst_82 = arith.constant dense<0.000000e+00> : vector<16xf32>
    %232 = vector.multi_reduction <add>, %229, %cst_82 [1] : vector<16x32xf32> to vector<16xf32>
    %233 = vector.shape_cast %232 : vector<16xf32> to vector<16x1xf32>
    %cst_83 = arith.constant 3.200000e+01 : f32
    %234 = vector.broadcast %cst_83 : f32 to vector<16x1xf32>
    %235 = arith.divf %233, %234 : vector<16x1xf32>
    %236 = vector.broadcast %235 : vector<16x1xf32> to vector<16x32xf32>
    %237 = arith.subf %229, %236 : vector<16x32xf32>
    %238 = arith.mulf %237, %237 : vector<16x32xf32>
    %cst_84 = arith.constant dense<0.000000e+00> : vector<16xf32>
    %239 = vector.multi_reduction <add>, %238, %cst_84 [1] : vector<16x32xf32> to vector<16xf32>
    %240 = vector.shape_cast %239 : vector<16xf32> to vector<16x1xf32>
    %cst_85 = arith.constant 3.200000e+01 : f32
    %241 = vector.broadcast %cst_85 : f32 to vector<16x1xf32>
    %242 = arith.divf %240, %241 : vector<16x1xf32>
    %243 = vector.broadcast %235 : vector<16x1xf32> to vector<16x32xf32>
    %244 = arith.subf %229, %243 : vector<16x32xf32>
    %cst_86 = arith.constant 9.99999974E-6 : f32
    %245 = vector.broadcast %cst_86 : f32 to vector<16x1xf32>
    %246 = arith.addf %242, %245 : vector<16x1xf32>
    %247 = math.rsqrt %246 : vector<16x1xf32>
    %248 = vector.broadcast %247 : vector<16x1xf32> to vector<16x32xf32>
    %249 = arith.mulf %244, %248 : vector<16x32xf32>
    %250 = vector.broadcast %230 : vector<1x32xf32> to vector<16x32xf32>
    %251 = arith.mulf %249, %250 : vector<16x32xf32>
    %252 = vector.broadcast %231 : vector<1x32xf32> to vector<16x32xf32>
    %253 = arith.addf %251, %252 : vector<16x32xf32>
    %254 = arith.truncf %253 : vector<16x32xf32> to vector<16x32xbf16>
    %c0_87 = arith.constant 0 : index
    %c0_88 = arith.constant 0 : index
    %c0_89 = arith.constant 0 : index
    %255 = vector.load %arg9[%c0_87, %c0_88, %c0_89] : memref<1x32x128xbf16, #tpu.memory_space<vmem>>, vector<1x32x128xbf16>
    %256 = vector.shape_cast %255 : vector<1x32x128xbf16> to vector<32x128xbf16>
    %cst_90 = arith.constant dense<0.000000e+00> : vector<16x128xf32>
    %257 = tpu.matmul %254, %256, %cst_90 {dimension_numbers = #tpu.dot_dimension_numbers<[1], [0], [0], [1], [0, 0, 1, 1], [], []>} : vector<16x32xbf16>, vector<32x128xbf16>, vector<16x128xf32> -> vector<16x128xf32>
    %c0_91 = arith.constant 0 : index
    %c0_92 = arith.constant 0 : index
    %c0_93 = arith.constant 0 : index
    %258 = vector.load %arg10[%c0_91, %c0_92, %c0_93] : memref<1x1x128xf32, #tpu.memory_space<vmem>>, vector<1x1x128xf32>
    %259 = vector.shape_cast %258 : vector<1x1x128xf32> to vector<1x128xf32>
    %260 = vector.broadcast %259 : vector<1x128xf32> to vector<16x128xf32>
    %261 = arith.addf %257, %260 : vector<16x128xf32>
    %262 = arith.mulf %261, %261 : vector<16x128xf32>
    %263 = arith.mulf %261, %262 : vector<16x128xf32>
    %cst_94 = arith.constant 4.471500e-02 : f32
    %264 = vector.broadcast %cst_94 : f32 to vector<16x128xf32>
    %265 = arith.mulf %264, %263 : vector<16x128xf32>
    %266 = arith.addf %261, %265 : vector<16x128xf32>
    %cst_95 = arith.constant 0.797884583 : f32
    %267 = vector.broadcast %cst_95 : f32 to vector<16x128xf32>
    %268 = arith.mulf %267, %266 : vector<16x128xf32>
    %269 = math.tanh %268 : vector<16x128xf32>
    %cst_96 = arith.constant 1.000000e+00 : f32
    %270 = vector.broadcast %cst_96 : f32 to vector<16x128xf32>
    %271 = arith.addf %270, %269 : vector<16x128xf32>
    %cst_97 = arith.constant 5.000000e-01 : f32
    %272 = vector.broadcast %cst_97 : f32 to vector<16x128xf32>
    %273 = arith.mulf %272, %271 : vector<16x128xf32>
    %274 = arith.mulf %261, %273 : vector<16x128xf32>
    %275 = arith.truncf %274 : vector<16x128xf32> to vector<16x128xbf16>
    %c0_98 = arith.constant 0 : index
    %c0_99 = arith.constant 0 : index
    %c0_100 = arith.constant 0 : index
    %276 = vector.load %arg11[%c0_98, %c0_99, %c0_100] : memref<1x128x32xbf16, #tpu.memory_space<vmem>>, vector<1x128x32xbf16>
    %277 = vector.shape_cast %276 : vector<1x128x32xbf16> to vector<128x32xbf16>
    %cst_101 = arith.constant dense<0.000000e+00> : vector<16x32xf32>
    %278 = tpu.matmul %275, %277, %cst_101 {dimension_numbers = #tpu.dot_dimension_numbers<[1], [0], [0], [1], [0, 0, 1, 1], [], []>} : vector<16x128xbf16>, vector<128x32xbf16>, vector<16x32xf32> -> vector<16x32xf32>
    %279 = arith.addf %229, %278 : vector<16x32xf32>
    %280 = vector.extract_strided_slice %5 {offsets = [8, 0], sizes = [1, 32], strides = [1, 1]} : vector<9x32xf32> to vector<1x32xf32>
    %281 = vector.broadcast %280 : vector<1x32xf32> to vector<16x32xf32>
    %282 = arith.addf %279, %281 : vector<16x32xf32>
    %c0_102 = arith.constant 0 : index
    %c0_103 = arith.constant 0 : index
    %283 = vector.load %arg13[%c0_102, %c0_103] : memref<16x32xf32, #tpu.memory_space<vmem>>, vector<16x32xf32>
    tpu.vector_store %arg13[%c0_102, %c0_103], %282 {strides = array<i32>} : memref<16x32xf32, #tpu.memory_space<vmem>>, vector<16x32xf32>,
    %c1_i32 = arith.constant 1 : i32
    %284 = arith.cmpi eq, %arg1, %c1_i32 : i32
    %285 = arith.extui %284 : i1 to i32
    %c0_i32_104 = arith.constant 0 : i32
    %286 = arith.cmpi ne, %285, %c0_i32_104 : i32
    scf.if %286 {
      %c0_105 = arith.constant 0 : index
      %c0_106 = arith.constant 0 : index
      %287 = vector.load %arg13[%c0_105, %c0_106] : memref<16x32xf32, #tpu.memory_space<vmem>>, vector<16x32xf32>
      %c0_107 = arith.constant 0 : index
      %c0_108 = arith.constant 0 : index
      %288 = vector.load %arg12[%c0_107, %c0_108] : memref<16x32xf32, #tpu.memory_space<vmem>>, vector<16x32xf32>
      tpu.vector_store %arg12[%c0_107, %c0_108], %287 {strides = array<i32>} : memref<16x32xf32, #tpu.memory_space<vmem>>, vector<16x32xf32>,
    } else {
    }
    return
  }
  func.func @transform_0(%arg0: i32, %arg1: i32) -> (i32, i32) {
    %c0_i32 = arith.constant 0 : i32
    %c0_i32_0 = arith.constant 0 : i32
    return %arg0, %c0_i32 : i32, i32
  }
  func.func @transform_1(%arg0: i32, %arg1: i32) -> (i32, i32) {
    %c0_i32 = arith.constant 0 : i32
    %c0_i32_0 = arith.constant 0 : i32
    %c0_i32_1 = arith.constant 0 : i32
    return %c0_i32, %c0_i32_0 : i32, i32
  }
  func.func @transform_2(%arg0: i32, %arg1: i32) -> (i32, i32, i32) {
    %c0_i32 = arith.constant 0 : i32
    %c0_i32_0 = arith.constant 0 : i32
    %c0_i32_1 = arith.constant 0 : i32
    return %arg1, %c0_i32, %c0_i32_0 : i32, i32, i32
  }
  func.func @transform_3(%arg0: i32, %arg1: i32) -> (i32, i32, i32) {
    %c0_i32 = arith.constant 0 : i32
    %c0_i32_0 = arith.constant 0 : i32
    %c0_i32_1 = arith.constant 0 : i32
    return %arg1, %c0_i32, %c0_i32_0 : i32, i32, i32
  }
  func.func @transform_4(%arg0: i32, %arg1: i32) -> (i32, i32, i32) {
    %c0_i32 = arith.constant 0 : i32
    %c0_i32_0 = arith.constant 0 : i32
    %c0_i32_1 = arith.constant 0 : i32
    return %arg1, %c0_i32, %c0_i32_0 : i32, i32, i32
  }
  func.func @transform_5(%arg0: i32, %arg1: i32) -> (i32, i32, i32) {
    %c0_i32 = arith.constant 0 : i32
    %c0_i32_0 = arith.constant 0 : i32
    %c0_i32_1 = arith.constant 0 : i32
    return %arg1, %c0_i32, %c0_i32_0 : i32, i32, i32
  }
  func.func @transform_6(%arg0: i32, %arg1: i32) -> (i32, i32, i32) {
    %c0_i32 = arith.constant 0 : i32
    %c0_i32_0 = arith.constant 0 : i32
    %c0_i32_1 = arith.constant 0 : i32
    return %arg1, %c0_i32, %c0_i32_0 : i32, i32, i32
  }
  func.func @transform_7(%arg0: i32, %arg1: i32) -> (i32, i32, i32) {
    %c0_i32 = arith.constant 0 : i32
    %c0_i32_0 = arith.constant 0 : i32
    %c0_i32_1 = arith.constant 0 : i32
    return %arg1, %c0_i32, %c0_i32_0 : i32, i32, i32
  }
  func.func @transform_8(%arg0: i32, %arg1: i32) -> (i32, i32, i32) {
    %c0_i32 = arith.constant 0 : i32
    %c0_i32_0 = arith.constant 0 : i32
    %c0_i32_1 = arith.constant 0 : i32
    return %arg1, %c0_i32, %c0_i32_0 : i32, i32, i32
  }
  func.func @transform_9(%arg0: i32, %arg1: i32) -> (i32, i32, i32) {
    %c0_i32 = arith.constant 0 : i32
    %c0_i32_0 = arith.constant 0 : i32
    %c0_i32_1 = arith.constant 0 : i32
    return %arg1, %c0_i32, %c0_i32_0 : i32, i32, i32
  }
  func.func @transform_10(%arg0: i32, %arg1: i32) -> (i32, i32) {
    %c0_i32 = arith.constant 0 : i32
    %c0_i32_0 = arith.constant 0 : i32
    return %arg0, %c0_i32 : i32, i32
  }
}

</mosaic_0001>

<bundles_post_ra>
// kernel: tpu_custom_call.1
= control target key start
LH: loop header
LB: loop body
LE: loop exit
PB: predicated region body
PF: predicated region fallthrough
CT: control target
= control target key end

     0   :  { %s2244_s0 = inlined_call_operand.vmem [shape: f32[16,32], index: 0, kind: input, shape index: {}]   ;;  %s2245_s1 = inlined_call_operand.vmem [shape: f32[8,8], index: 1, kind: input, shape index: {}]   ;;  %s2246_s2 = inlined_call_operand.vmem [shape: f32[2,9,32], index: 2, kind: input, shape index: {}]   ;;  %s2247_s3 = inlined_call_operand.vmem [shape: bf16[2,32,32], index: 3, kind: input, shape index: {}]   ;;  %s2248_s4 = inlined_call_operand.vmem [shape: bf16[2,32,32], index: 4, kind: input, shape index: {}]   ;;  %s2249_s5 = inlined_call_operand.vmem [shape: bf16[2,32,32], index: 5, kind: input, shape index: {}]   ;;  %s2250_s6 = inlined_call_operand.vmem [shape: bf16[2,32,32], index: 6, kind: input, shape index: {}]   ;;  %s2251_s7 = inlined_call_operand.vmem [shape: bf16[2,32,128], index: 7, kind: input, shape index: {}]   ;;  %s2252_s8 = inlined_call_operand.vmem [shape: f32[2,1,128], index: 8, kind: input, shape index: {}]   ;;  %s2253_s9 = inlined_call_operand.vmem [shape: bf16[2,128,32], index: 9, kind: input, shape index: {}]   ;;  %s2254_s10 = inlined_call_operand.hbm [shape: f32[16,32], index: 10, kind: output, shape index: {}]  }
   0x1   :  { %2255 = sst [smem:[#allocation7_spill]] %s2246_s2 }
   0x2   :  { %2256 = sst [smem:[#allocation8_spill]] %s2247_s3 }
   0x3   :  { %15 = vsyncpa [#allocation5], 0  ;;  %s1954_s13 = smov 0   ;;  %s1956_s14 = smov 0  }
   0x4   :  { %s1958_s15 = smov 0  }
   0x5 LB: > { %s30_s17 = sadd.s32 1, %s1884_s14  ;;  %p1608_p1 = scmp.ge.s32.totalorder %s1888_s15, 1  ;;  %s1888_s15 = sphi %s1958_s15, %s21_s15   ;;  %s1884_s14 = sphi %s1956_s14, %s2262_s14   ;;  %s1880_s13 = sphi %s1954_s13, %s2261_s13  }
   0x6   : > { %p31_p0 = scmp.ge.s32.totalorder %s30_s17, 2  ;;  %p404_p2 = scmp.lt.s32.totalorder %s1888_s15, 3 }
   0x8   : > { %s2264_s17 = smov (%p31_p0, %s30_s17), 0  ;;  %p405_p3 = pnand %p1608_p1, %p404_p2 }
   0x9   : > { %p481_p4 = scmp.lt.s32.totalorder (!%p405_p3), %s1880_s13, 1  ;;  %s2257_s2 = sld [smem:[#allocation7_spill]] (!%p405_p3) }
   0xa   : > { %408 = sbr.rel (%p405_p3) target bundleno = 2005 (0x7d5), region = 60  ;;  %s2258_s3 = sld [smem:[#allocation8_spill]] (!%p405_p3) }
   0xb   : > { %p1623_p5 = scmp.ne.s32.totalorder (!%p405_p3), %s1880_s13, 0 }
   0xf   : > { %s1977_s18 = scalar_select %p481_p4, %s1880_s13, 1 }
  0x11   : > { %s1722_s19 = sshll.u32 %s1977_s18, 4  ;;  %s1728_s27 = sshll.u32 %s1977_s18, 6 }
  0x12   : > { %s1987_s25 = scalar_lea.vmem %s2257_s2, %s1722_s19  ;;  %s1992_s28 = scalar_lea.vmem %s2258_s3, %s1722_s19 }
  0x13   : > { %s1997_s11 = scalar_lea.vmem %s2248_s4, %s1722_s19  ;;  %s2002_s20 = scalar_lea.vmem %s2249_s5, %s1722_s19 }
  0x14   : > { %s2007_s23 = scalar_lea.vmem %s2250_s6, %s1722_s19  ;;  %s2012_s26 = scalar_lea.vmem %s2251_s7, %s1722_s19 }
  0x15   : > { %s2018_s30 = scalar_lea.vmem %s2253_s9, %s1728_s27  ;;  %524 = sbr.rel (%p1623_p5) target bundleno = 29 (0x1d), region = 64 }
  0x1a   : > { %v525_v0 = vld [vmem:[%s2244_s0] sm:$0xff]  ;;  %vm527_vm0 = vcmask 261120   ;;  %v526_v1 = vld [vmem:[%s2244_s0 + $0x8] sm:$0xff] }
  0x1b   : > { %528 = vst.msk [vmem:[#allocation2] sm:$0xff] %vm527_vm0, %v525_v0 }
  0x1c   : > { %529 = vst.msk [vmem:[#allocation2 + $0x8] sm:$0xff] %vm527_vm0, %v526_v1 }
  0x1d PF: > { %vm534_vm1 = vcmask 261120   ;;  %v1890_v6 = vmov 32.0   ;;  %v1730_v23 = vld [vmem:[%s1992_s28 + $0x8] sm:$0xff]  ;;  %v1729_v26 = vld [vmem:[%s1992_s28] sm:$0xff]  ;;  %vm696_vm9 = vcmask 64512   ;;  %s1891_s2 = smov 104   ;;  %s2259_s29 = scalar_lea.vmem %s2252_s8, %s1977_s18 }
  0x1e   : > { %1788 = vrcp.f32 %v1890_v6  ;;  %v1732_v24 = vld [vmem:[%s1997_s11 + $0x8] sm:$0xff]  ;;  %619 = vmatpush.bf16.msra.mxu0 %v1730_v23  ;;  %v1731_v27 = vld [vmem:[%s1997_s11] sm:$0xff]  ;;  %s1892_s3 = smov 112   ;;  %s1893_s19 = smov 120   ;;  %vm733_vm10 = vcmask 1043456   ;;  %vm822_vm11 = vcmask 130112  }
  0x1f   : > { %650 = vmatpush.bf16.msra.mxu2 %v1732_v24  ;;  %v1734_v30 = vld [vmem:[%s2002_s20 + $0x8] sm:$0xff]  ;;  %v1733_v33 = vld [vmem:[%s2002_s20] sm:$0xff]  ;;  %s1894_s20 = smov 8   ;;  %s1895_s24 = smov 16   ;;  %vm886_vm12 = vcmask 195712   ;;  %vm950_vm13 = vcmask 261312  }
  0x20   : > { %v2052_v46 = vld [vmem:[%s1987_s25] sm:$0xff]  ;;  %s1896_s27 = smov 24   ;;  %p1717_p6 = scmp.ne.s32.totalorder %s1880_s13, 1 }
  0x21   : > { %v586_v49 = vperm.slane %v2052_v46, 0  ;;  %v589_v54 = vperm.slane %v2052_v46, 1  ;;  %v631_v60 = vperm.slane %v2052_v46, 5  ;;  %v597_v61 = vperm.slane %v2052_v46, 4 }
  0x22   : > { %v2027_v2 = vld [vmem:[#allocation2] sm:$0xff]  ;;  %620 = vmatpush.bf16.msra.mxu0 %v1729_v26 }
  0x23   : > { %v535_v3 = vsel %vm534_vm1, %v2027_v2, 0.0  ;;  %v2031_v4 = vld [vmem:[#allocation2 + $0x8] sm:$0xff]  ;;  %651 = vmatpush.bf16.msra.mxu2 %v1731_v27 }
  0x24   : > { %536 = vadd.xlane.f32.xlu0 %v535_v3  ;;  %v538_v5 = vsel %vm534_vm1, %v2031_v4, 0.0  ;;  %v1789_v7 = vpop.eup %1788 }
  0x25   : > { %v542_v8 = vmul.f32 32.0, %v1789_v7  ;;  %vm546_vm2 = vweird.f32 %v1789_v7 }
  0x27   : > { %v543_v9 = vsub.f32 1.0, %v542_v8  ;;  %681 = vmatpush.bf16.msrb.mxu2 %v1734_v30 }
  0x29   : > { %v544_v10 = vmul.f32 %v1789_v7, %v543_v9 }
  0x2b   : > { %v545_v11 = vadd.f32 %v1789_v7, %v544_v10  ;;  %682 = vmatpush.bf16.msrb.mxu2 %v1733_v33 }
  0x2c   : > { %539 = vadd.xlane.f32.xlu0 %v538_v5 }
  0x2d   : > { %v2035_v12 = vsel %vm546_vm2, %v1789_v7, %v545_v11 }
  0x97   : > { %v537_v13 = vpop.xlane.xlu0 %536 }
  0x98   : > { %v548_v14 = vmul.f32 %v2035_v12, %v537_v13 }
  0x9a   : > { %v550_v15 = vsub.f32 %v2027_v2, %v548_v14 }
  0x9c   : > { %v552_v16 = vmul.f32 %v550_v15, %v550_v15 }
  0x9e   : > { %v554_v17 = vsel %vm534_vm1, %v552_v16, 0.0 }
  0x9f   : > { %555 = vadd.xlane.f32.xlu1 %v554_v17  ;;  %v540_v18 = vpop.xlane.xlu0 %539 }
  0xa0   : > { %v549_v19 = vmul.f32 %v2035_v12, %v540_v18  ;;  %v662_v18 = vperm.slane %v2052_v46, 6 }
  0xa2   : > { %v551_v20 = vsub.f32 %v2031_v4, %v549_v19 }
  0xa4   : > { %v553_v21 = vmul.f32 %v551_v20, %v551_v20 }
  0xa6   : > { %v557_v22 = vsel %vm534_vm1, %v553_v21, 0.0 }
  0xa7   : > { %558 = vadd.xlane.f32.xlu1 %v557_v22 }
 0x112   : > { %v556_v25 = vpop.xlane.xlu1 %555 }
 0x113   : > { %v560_v28 = vmul.f32 %v556_v25, %v2035_v12 }
 0x115   : > { %v562_v29 = vadd.f32 1e-05, %v560_v28 }
 0x117   : > { %1790 = vrsqrt.f32 %v562_v29  ;;  %vm570_vm4 = vweird.f32 %v562_v29 }
 0x11a   : > { %v559_v31 = vpop.xlane.xlu1 %558 }
 0x11b   : > { %v561_v32 = vmul.f32 %v559_v31, %v2035_v12 }
 0x11d   : > { %v1791_v34 = vpop.eup %1790  ;;  %v563_v35 = vadd.f32 1e-05, %v561_v32 }
 0x11e   : > { %v565_v36 = vmul.f32 %v1791_v34, %v562_v29  ;;  %vm571_vm3 = vweird.f32 %v1791_v34 }
 0x11f   : > { %1792 = vrsqrt.f32 %v563_v35  ;;  %vm572_vm5 = vmor %vm570_vm4, %vm571_vm3  ;;  %vm580_vm7 = vweird.f32 %v563_v35 }
 0x120   : > { %v566_v37 = vmul.f32 %v1791_v34, %v565_v36 }
 0x122   : > { %v567_v38 = vmul.f32 0.5, %v566_v37 }
 0x124   : > { %v568_v39 = vsub.f32 1.5, %v567_v38 }
 0x125   : > { %v1793_v40 = vpop.eup %1792 }
 0x126   : > { %v569_v41 = vmul.f32 %v1791_v34, %v568_v39  ;;  %v575_v42 = vmul.f32 %v1793_v40, %v563_v35  ;;  %vm581_vm6 = vweird.f32 %v1793_v40 }
 0x127   : > { %vm582_vm8 = vmor %vm580_vm7, %vm581_vm6 }
 0x128   : > { %v576_v43 = vmul.f32 %v1793_v40, %v575_v42  ;;  %v573_v44 = vsel %vm572_vm5, %v1791_v34, %v569_v41 }
 0x129   : > { %v584_v48 = vmul.f32 %v573_v44, %v550_v15 }
 0x12a   : > { %v577_v45 = vmul.f32 0.5, %v576_v43  ;;  %v2098_v43 = vld [vmem:[%s2245_s1] sm:$0xff] }
 0x12b   : > { %v587_v53 = vmul.f32 %v586_v49, %v584_v48 }
 0x12c   : > { %v578_v47 = vsub.f32 1.5, %v577_v45 }
 0x12d   : > { %v590_v56 = vadd.f32 %v589_v54, %v587_v53 }
 0x12e   : > { %v579_v50 = vmul.f32 %v1793_v40, %v578_v47 }
 0x130   : > { %v583_v51 = vsel %vm582_vm8, %v1793_v40, %v579_v50 }
 0x131   : > { %v585_v52 = vmul.f32 %v583_v51, %v551_v20 }
 0x133   : > { %v588_v55 = vmul.f32 %v586_v49, %v585_v52 }
 0x135   : > { %v591_v57 = vadd.f32 %v589_v54, %v588_v55 }
 0x137   : > { %v592_v58 = vpack.c.bf16 %v591_v57, %v590_v56 }
 0x139   : > { %1632 = vmatmul.msk.bf16.vlgmr.msra.gmra.mxu0 %vm534_vm1, %v592_v58  ;;  %1641 = vmatmul.msk.bf16.vlgmr.msra.gmra.mxu2 %vm534_vm1, %v592_v58 }
 0x149   : > { %1650 = vmatmul.msk.bf16.vlgmr.msrb.gmra.mxu2 %vm534_vm1, %v592_v58 }
 0x1b6   : > { %v622_v59 = vpop.f32.mrf.mxu0 }
 0x1b7   : > { %v623_v5 = vadd.f32 %v622_v59, %v597_v61 }
 0x1b9   : > { %v689_v10 = vpack.c.bf16 %v623_v5, %v623_v5 }
 0x1bb   : > { %v752_v16 = vunpack.c.l.b16 %v689_v10 }
 0x1bc   : > { %v653_v62 = vpop.f32.mrf.mxu2 }
 0x1bd   : > { %v654_v63 = vadd.f32 %v653_v62, %v631_v60  ;;  %v753_v21 = vpack.c.b16 %v752_v16, %v752_v16 }
 0x1be   : > { %v624_v0 = vpop.f32.mrf.mxu0 }
 0x1bf   : > { %v691_v1 = vpack.c.bf16 %v654_v63, %v654_v63  ;;  %v625_v3 = vadd.f32 %v624_v0, %v597_v61 }
 0x1c1   : > { %v757_v6 = vunpack.c.l.b16 %v691_v1  ;;  %v701_v7 = vsel %vm696_vm9, %v691_v1, 0  ;;  %v2062_v9 = vpack.c.bf16 %v625_v3, %v625_v3 }
 0x1c2   : > { %710 = vmatpush.bf16.xpose.msra.mxu3 %v701_v7 }
 0x1c3   : > { %v758_v8 = vpack.c.b16 %v757_v6, %v757_v6  ;;  %v1006_v14 = vunpack.c.l.b16 %v2062_v9 }
 0x1c4   : > { %v655_v11 = vpop.f32.mrf.mxu2 }
 0x1c5   : > { %v656_v13 = vadd.f32 %v655_v11, %v631_v60  ;;  %890 = vrot.lane.b32.xlu1 %v758_v8, %s1891_s2  ;;  %826 = vrot.lane.b32.xlu0 %v758_v8, %s1892_s3  ;;  %v1007_v19 = vpack.c.b16 %v1006_v14, %v1006_v14 }
 0x1c6   : > { %759 = vrot.lane.b32.xlu2 %v758_v8, %s1893_s19 }
 0x1c7   : > { %v692_v15 = vpack.c.bf16 %v656_v13, %v656_v13 }
 0x1c9   : > { %v1011_v17 = vunpack.c.l.b16 %v692_v15  ;;  %1651 = vmatmul.msk.bf16.vlgmr.msra.gmra.mxu3 %vm696_vm9, %v689_v10  ;;  %v956_v35 = vsel %vm696_vm9, %v692_v15, 0 }
 0x1cb   : > { %v1012_v20 = vpack.c.b16 %v1011_v17, %v1011_v17 }
 0x1cc   : > { %v684_v22 = vpop.f32.mrf.mxu2 }
 0x1cd   : > { %v685_v23 = vadd.f32 %v684_v22, %v662_v18  ;;  %1142 = vrot.lane.b32.xlu1 %v1012_v20, %s1891_s2  ;;  %1008 = vrot.lane.b32.xlu0 %v1007_v19, %s1893_s19 }
 0x1ce   : > { %754 = vrot.lane.b32.xlu2 %v753_v21, %s1893_s19 }
 0x1cf   : > { %v2075_v24 = vpack.c.bf16 %v685_v23, %v685_v23 }
 0x1d1   : > { %v735_v25 = vsel %vm733_vm10, %v2075_v24, 0  ;;  %v795_v23 = vunpack.c.l.b16 %v2075_v24 }
 0x1d2   : > { %744 = vmatpush.bf16.msrb.mxu0 %v735_v25 }
 0x1d5   : > { %1077 = vrot.lane.b32.xlu0 %v1007_v19, %s1892_s3 }
 0x1d6   : > { %824 = vrot.lane.b32.xlu2 %v753_v21, %s1892_s3 }
 0x1de   : > { %888 = vrot.lane.b32.xlu2 %v753_v21, %s1891_s2 }
 0x1e6   : > { %1013 = vrot.lane.b32.xlu2 %v1012_v20, %s1893_s19 }
 0x1ee   : > { %1079 = vrot.lane.b32.xlu2 %v1012_v20, %s1892_s3 }
 0x1f6   : > { %1140 = vrot.lane.b32.xlu2 %v1007_v19, %s1891_s2 }
 0x220   : > { %v760_v26 = vpop.permute.xlu2 %759 }
 0x221   : > { %v765_v27 = vsel %vm696_vm9, %v760_v26, 0 }
 0x222   : > { %774 = vmatpush.bf16.xpose.msra.mxu1 %v765_v27  ;;  %v796_v27 = vpack.c.b16 %v795_v23, %v795_v23 }
 0x228   : > { %v755_v28 = vpop.permute.xlu2 %754 }
 0x229   : > { %1653 = vmatmul.msk.bf16.vlgmr.msra.gmra.mxu1 %vm696_vm9, %v755_v28 }
 0x230   : > { %v825_v29 = vpop.permute.xlu2 %824 }
 0x237   : > { %v891_v30 = vpop.permute.xlu1 %890  ;;  %v827_v31 = vpop.permute.xlu0 %826 }
 0x238   : > { %v889_v32 = vpop.permute.xlu2 %888  ;;  %v832_v33 = vsel %vm696_vm9, %v827_v31, 0  ;;  %v896_v34 = vsel %vm696_vm9, %v891_v30, 0 }
 0x239   : > { %841 = vmatpush.bf16.xpose.msrb.mxu3 %v832_v33  ;;  %905 = vmatpush.bf16.xpose.msrb.mxu1 %v896_v34 }
 0x23f   : > { %v1143_v36 = vpop.permute.xlu1 %1142  ;;  %v1009_v45 = vpop.permute.xlu0 %1008 }
 0x240   : > { %v1148_v37 = vsel %vm696_vm9, %v1143_v36, 0  ;;  %v1014_v38 = vpop.permute.xlu2 %1013  ;;  %1655 = vmatmul.msk.bf16.vlgmr.msrb.gmra.mxu3 %vm696_vm9, %v825_v29  ;;  %1657 = vmatmul.msk.bf16.vlgmr.msrb.gmra.mxu1 %vm696_vm9, %v889_v32 }
 0x241   : > { %965 = vmatpush.bf16.xpose.msra.mxu3 %v956_v35  ;;  %v1019_v39 = vsel %vm696_vm9, %v1014_v38, 0 }
 0x242   : > { %1028 = vmatpush.bf16.xpose.msra.mxu1 %v1019_v39 }
 0x247   : > { %v1078_v50 = vpop.permute.xlu0 %1077 }
 0x248   : > { %v1080_v40 = vpop.permute.xlu2 %1079 }
 0x249   : > { %v1085_v41 = vsel %vm696_vm9, %v1080_v40, 0 }
 0x24a   : > { %1157 = vmatpush.bf16.xpose.msrb.mxu1 %v1148_v37  ;;  %1094 = vmatpush.bf16.xpose.msrb.mxu3 %v1085_v41 }
 0x24c   : > { %v712_v42 = vpop.f32.mrf.mxu3 }
 0x24d   : > { %v716_v44 = vmul.f32 0.35355338, %v712_v42 }
 0x24f   : > { %v717_v47 = vadd.f32 %v716_v44, %v2098_v43 }
 0x250   : > { %1659 = vmatmul.msk.bf16.vlgmr.msra.gmra.mxu3 %vm696_vm9, %v2062_v9  ;;  %1661 = vmatmul.msk.bf16.vlgmr.msra.gmra.mxu1 %vm696_vm9, %v1009_v45  ;;  %v1141_v51 = vpop.permute.xlu2 %1140 }
 0x251   : > { %v718_v48 = vsel %vm696_vm9, %v717_v47, -inf }
 0x252   : > { %719 = vmax.xlane.f32.xlu0 %v718_v48 }
 0x254   : > { %v714_v49 = vpop.f32.mrf.mxu3 }
 0x260   : > { %1663 = vmatmul.msk.bf16.vlgmr.msrb.gmra.mxu3 %vm696_vm9, %v1078_v50  ;;  %1665 = vmatmul.msk.bf16.vlgmr.msrb.gmra.mxu1 %vm696_vm9, %v1141_v51 }
 0x2a6   : > { %v776_v52 = vpop.f32.mrf.mxu1 }
 0x2a7   : > { %v780_v53 = vmul.f32 0.35355338, %v776_v52 }
 0x2a9   : > { %v781_v54 = vadd.f32 %v780_v53, %v2098_v43 }
 0x2ab   : > { %v782_v55 = vsel %vm696_vm9, %v781_v54, -inf }
 0x2ac   : > { %783 = vmax.xlane.f32.xlu1 %v782_v55 }
 0x2ae   : > { %v778_v56 = vpop.f32.mrf.mxu1 }
 0x2bd   : > { %v907_v57 = vpop.f32.mrf.mxu1 }
 0x2be   : > { %v911_v58 = vmul.f32 0.35355338, %v907_v57 }
 0x2c0   : > { %v912_v59 = vadd.f32 %v911_v58, %v2098_v43 }
 0x2c2   : > { %v913_v60 = vsel %vm696_vm9, %v912_v59, -inf }
 0x2c3   : > { %914 = vmax.xlane.f32.xlu2 %v913_v60  ;;  %v843_v61 = vpop.f32.mrf.mxu3 }
 0x2c4   : > { %v847_v62 = vmul.f32 0.35355338, %v843_v61  ;;  %v686_v61 = vpop.f32.mrf.mxu2 }
 0x2c5   : > { %v909_v63 = vpop.f32.mrf.mxu1  ;;  %v720_v0 = vpop.xlane.xlu0 %719 }
 0x2c6   : > { %v721_v1 = vsub.f32 %v717_v47, %v720_v0  ;;  %v848_v3 = vadd.f32 %v847_v62, %v2098_v43  ;;  %v687_v63 = vadd.f32 %v686_v61, %v662_v18 }
 0x2c8   : > { %v722_v5 = vmul.f32 1.442695, %v721_v1  ;;  %v849_v6 = vsel %vm696_vm9, %v848_v3, -inf  ;;  %v694_v1 = vpack.c.bf16 %v687_v63, %v687_v63 }
 0x2c9   : > { %850 = vmax.xlane.f32.xlu1 %v849_v6 }
 0x2ca   : > { %1794 = vpow2.f32 %v722_v5 }
 0x2cb   : > { %v845_v7 = vpop.f32.mrf.mxu3 }
 0x2cc   : > { %v1049_v7 = vunpack.c.l.b16 %v694_v1 }
 0x2cd   : > { %v1030_v8 = vpop.f32.mrf.mxu1 }
 0x2ce   : > { %v1034_v9 = vmul.f32 0.35355338, %v1030_v8  ;;  %v1050_v18 = vpack.c.b16 %v1049_v7, %v1049_v7 }
 0x2d0   : > { %v1795_v10 = vpop.eup %1794  ;;  %v1035_v11 = vadd.f32 %v1034_v9, %v2098_v43 }
 0x2d1   : > { %v724_v13 = vsel %vm696_vm9, %v1795_v10, 0.0 }
 0x2d2   : > { %725 = vadd.xlane.f32.xlu1 %v724_v13  ;;  %v1036_v14 = vsel %vm696_vm9, %v1035_v11, -inf  ;;  %v989_v13 = vsel %vm733_vm10, %v694_v1, 0 }
 0x2d3   : > { %1037 = vmax.xlane.f32.xlu0 %v1036_v14  ;;  %v967_v15 = vpop.f32.mrf.mxu3 }
 0x2d4   : > { %v971_v16 = vmul.f32 0.35355338, %v967_v15 }
 0x2d5   : > { %v1032_v17 = vpop.f32.mrf.mxu1 }
 0x2d6   : > { %v972_v19 = vadd.f32 %v971_v16, %v2098_v43 }
 0x2d8   : > { %v973_v20 = vsel %vm696_vm9, %v972_v19, -inf }
 0x2d9   : > { %974 = vmax.xlane.f32.xlu2 %v973_v20 }
 0x2db   : > { %v969_v21 = vpop.f32.mrf.mxu3 }
 0x2dd   : > { %v1159_v22 = vpop.f32.mrf.mxu1 }
 0x2de   : > { %v1163_v32 = vmul.f32 0.35355338, %v1159_v22 }
 0x2e0   : > { %v2128_v24 = vadd.f32 %v1163_v32, %v2098_v43 }
 0x2e2   : > { %v1165_v33 = vsel %vm696_vm9, %v2128_v24, -inf }
 0x2e3   : > { %v1096_v25 = vpop.f32.mrf.mxu3 }
 0x2e4   : > { %v1100_v26 = vmul.f32 0.35355338, %v1096_v25 }
 0x2e5   : > { %v1161_v28 = vpop.f32.mrf.mxu1 }
 0x2e6   : > { %v2120_v29 = vadd.f32 %v1100_v26, %v2098_v43 }
 0x2e7   : > { %797 = vrot.lane.b32.xlu0 %v796_v27, %s1893_s19 }
 0x2e8   : > { %v1102_v30 = vsel %vm696_vm9, %v2120_v29, -inf }
 0x2e9   : > { %1103 = vmax.xlane.f32.xlu2 %v1102_v30 }
 0x2eb   : > { %861 = vrot.lane.b32.xlu1 %v796_v27, %s1892_s3  ;;  %v1098_v31 = vpop.f32.mrf.mxu3 }
 0x301   : > { %925 = vrot.lane.b32.xlu2 %v796_v27, %s1891_s2 }
 0x315   : > { %1166 = vmax.xlane.f32.xlu1 %v1165_v33 }
 0x31f   : > { %v784_v34 = vpop.xlane.xlu1 %783 }
 0x320   : > { %v785_v35 = vsub.f32 %v781_v54, %v784_v34 }
 0x322   : > { %v786_v36 = vmul.f32 1.442695, %v785_v35 }
 0x324   : > { %1796 = vpow2.f32 %v786_v36 }
 0x32a   : > { %v2132_v37 = vpop.eup %1796 }
 0x32b   : > { %v788_v38 = vsel %vm696_vm9, %v2132_v37, 0.0 }
 0x32c   : > { %789 = vadd.xlane.f32.xlu0 %v788_v38 }
 0x336   : > { %v915_v39 = vpop.xlane.xlu2 %914 }
 0x337   : > { %v916_v40 = vsub.f32 %v912_v59, %v915_v39 }
 0x339   : > { %v917_v41 = vmul.f32 1.442695, %v916_v40 }
 0x33b   : > { %1798 = vpow2.f32 %v917_v41 }
 0x33c   : > { %v851_v42 = vpop.xlane.xlu1 %850 }
 0x33d   : > { %v852_v43 = vsub.f32 %v848_v3, %v851_v42 }
 0x33f   : > { %v853_v44 = vmul.f32 1.442695, %v852_v43 }
 0x341   : > { %v2136_v45 = vpop.eup %1798  ;;  %1800 = vpow2.f32 %v853_v44 }
 0x342   : > { %v919_v47 = vsel %vm696_vm9, %v2136_v45, 0.0 }
 0x343   : > { %920 = vadd.xlane.f32.xlu2 %v919_v47 }
 0x345   : > { %v726_v48 = vpop.xlane.xlu1 %725 }
 0x346   : > { %1802 = vrcp.f32 %v726_v48  ;;  %v1038_v49 = vpop.xlane.xlu0 %1037 }
 0x347   : > { %v2140_v50 = vpop.eup %1800  ;;  %v1039_v51 = vsub.f32 %v1035_v11, %v1038_v49 }
 0x348   : > { %v855_v52 = vsel %vm696_vm9, %v2140_v50, 0.0 }
 0x349   : > { %v1040_v53 = vmul.f32 1.442695, %v1039_v51  ;;  %856 = vadd.xlane.f32.xlu1 %v855_v52 }
 0x34b   : > { %1804 = vpow2.f32 %v1040_v53 }
 0x34c   : > { %v1803_v54 = vpop.eup %1802  ;;  %v975_v55 = vpop.xlane.xlu2 %974 }
 0x34d   : > { %v728_v56 = vmul.f32 %v1803_v54, %v1795_v10  ;;  %v976_v57 = vsub.f32 %v972_v19, %v975_v55 }
 0x34f   : > { %v977_v58 = vmul.f32 1.442695, %v976_v57  ;;  %v729_v59 = vpack.c.bf16 %v728_v56, %v728_v56 }
 0x351   : > { %v2144_v60 = vpop.eup %1804  ;;  %1806 = vpow2.f32 %v977_v58  ;;  %1652 = vmatmul.msk.bf16.vlgmr.msrb.gmra.mxu0 %vm696_vm9, %v729_v59 }
 0x352   : > { %v1042_v62 = vsel %vm696_vm9, %v2144_v60, 0.0 }
 0x353   : > { %1043 = vadd.xlane.f32.xlu0 %v1042_v62 }
 0x357   : > { %v1807_v0 = vpop.eup %1806 }
 0x358   : > { %v979_v3 = vsel %vm696_vm9, %v1807_v0, 0.0 }
 0x359   : > { %v798_v5 = vpop.permute.xlu0 %797  ;;  %980 = vadd.xlane.f32.xlu2 %v979_v3 }
 0x35a   : > { %v803_v6 = vsel %vm733_vm10, %v798_v5, 0 }
 0x35b   : > { %812 = vmatpush.bf16.msra.mxu2 %v803_v6 }
 0x35c   : > { %v1104_v8 = vpop.xlane.xlu2 %1103 }
 0x35d   : > { %v1105_v9 = vsub.f32 %v2120_v29, %v1104_v8  ;;  %v862_v10 = vpop.permute.xlu1 %861 }
 0x35e   : > { %v867_v11 = vsel %vm733_vm10, %v862_v10, 0 }
 0x35f   : > { %v1106_v14 = vmul.f32 1.442695, %v1105_v9  ;;  %876 = vmatpush.bf16.msra.mxu0 %v867_v11 }
 0x361   : > { %1808 = vpow2.f32 %v1106_v14 }
 0x362   : > { %1051 = vrot.lane.b32.xlu1 %v1050_v18, %s1893_s19 }
 0x363   : > { %998 = vmatpush.bf16.msrb.mxu0 %v989_v13 }
 0x364   : > { %v926_v15 = vpop.permute.xlu2 %925 }
 0x365   : > { %v931_v16 = vsel %vm733_vm10, %v926_v15, 0 }
 0x366   : > { %940 = vmatpush.bf16.msrb.mxu2 %v931_v16 }
 0x367   : > { %v1809_v17 = vpop.eup %1808 }
 0x368   : > { %v1108_v19 = vsel %vm696_vm9, %v1809_v17, 0.0 }
 0x369   : > { %1109 = vadd.xlane.f32.xlu0 %v1108_v19  ;;  %v1736_v19 = vld [vmem:[%s2007_s23 + $0x8] sm:$0xff] }
 0x36a   : > { %1231 = vmatpush.bf16.msra.mxu3 %v1736_v19  ;;  %v1786_v19 = vld [vmem:[%s2259_s29] ss:$0 sm:$0xff] }
 0x371   : > { %1114 = vrot.lane.b32.xlu2 %v1050_v18, %s1892_s3 }
 0x37d   : > { %1177 = vrot.lane.b32.xlu0 %v1050_v18, %s1891_s2 }
 0x388   : > { %v1167_v20 = vpop.xlane.xlu1 %1166 }
 0x389   : > { %v1168_v21 = vsub.f32 %v2128_v24, %v1167_v20  ;;  %v1735_v20 = vld [vmem:[%s2007_s23] sm:$0xff] }
 0x38a   : > { %1232 = vmatpush.bf16.msra.mxu3 %v1735_v20 }
 0x38b   : > { %v1169_v22 = vmul.f32 1.442695, %v1168_v21 }
 0x38d   : > { %1810 = vpow2.f32 %v1169_v22 }
 0x393   : > { %v1811_v23 = vpop.eup %1810 }
 0x394   : > { %v1171_v25 = vsel %vm696_vm9, %v1811_v23, 0.0 }
 0x395   : > { %1172 = vadd.xlane.f32.xlu1 %v1171_v25 }
 0x39f   : > { %v790_v26 = vpop.xlane.xlu0 %789 }
 0x3a0   : > { %1812 = vrcp.f32 %v790_v26 }
 0x3a6   : > { %v1813_v27 = vpop.eup %1812 }
 0x3a7   : > { %v792_v28 = vmul.f32 %v1813_v27, %v2132_v37  ;;  %v1241_v27 = vperm.slane %v2052_v46, 7 }
 0x3a9   : > { %v793_v29 = vpack.c.bf16 %v792_v28, %v792_v28 }
 0x3ab   : > { %1654 = vmatmul.msk.bf16.vlgmr.msra.gmra.mxu2 %vm696_vm9, %v793_v29 }
 0x3b6   : > { %v921_v30 = vpop.xlane.xlu2 %920 }
 0x3b7   : > { %1814 = vrcp.f32 %v921_v30 }
 0x3bc   : > { %v857_v31 = vpop.xlane.xlu1 %856 }
 0x3bd   : > { %v1815_v32 = vpop.eup %1814  ;;  %1816 = vrcp.f32 %v857_v31 }
 0x3be   : > { %v923_v24 = vmul.f32 %v1815_v32, %v2136_v45 }
 0x3c0   : > { %v924_v33 = vpack.c.bf16 %v923_v24, %v923_v24 }
 0x3c2   : > { %1658 = vmatmul.msk.bf16.vlgmr.msrb.gmra.mxu2 %vm696_vm9, %v924_v33 }
 0x3c3   : > { %v1817_v34 = vpop.eup %1816 }
 0x3c4   : > { %v859_v35 = vmul.f32 %v1817_v34, %v2140_v50 }
 0x3c6   : > { %v860_v36 = vpack.c.bf16 %v859_v35, %v859_v35  ;;  %v1044_v38 = vpop.xlane.xlu0 %1043 }
 0x3c7   : > { %1818 = vrcp.f32 %v1044_v38 }
 0x3c8   : > { %1656 = vmatmul.msk.bf16.vlgmr.msra.gmra.mxu0 %vm696_vm9, %v860_v36 }
 0x3cc   : > { %v981_v37 = vpop.xlane.xlu2 %980 }
 0x3cd   : > { %1820 = vrcp.f32 %v981_v37  ;;  %v1819_v40 = vpop.eup %1818 }
 0x3ce   : > { %v746_v39 = vpop.f32.mrf.mxu0  ;;  %v1046_v42 = vmul.f32 %v1819_v40, %v2144_v60 }
 0x3cf   : > { %750 = vst.msk [vmem:[#allocation3] sm:$0xff] %vm696_vm9, %v746_v39 }
 0x3d0   : > { %v1047_v51 = vpack.c.bf16 %v1046_v42, %v1046_v42 }
 0x3d3   : > { %v1821_v41 = vpop.eup %1820 }
 0x3d4   : > { %v983_v43 = vmul.f32 %v1821_v41, %v1807_v0  ;;  %v1052_v44 = vpop.permute.xlu1 %1051  ;;  %v1115_v45 = vpop.permute.xlu2 %1114 }
 0x3d5   : > { %v1057_v47 = vsel %vm733_vm10, %v1052_v44, 0  ;;  %v1120_v48 = vsel %vm733_vm10, %v1115_v45, 0 }
 0x3d6   : > { %v984_v49 = vpack.c.bf16 %v983_v43, %v983_v43  ;;  %v748_v50 = vpop.f32.mrf.mxu0  ;;  %1066 = vmatpush.bf16.msra.mxu2 %v1057_v47  ;;  %1129 = vmatpush.bf16.msra.mxu0 %v1120_v48  ;;  %v1738_v43 = vld [vmem:[%s2012_s26 + $0x8] sm:$0xff]  ;;  %v1737_v48 = vld [vmem:[%s2012_s26] sm:$0xff] }
 0x3d8   : > { %1660 = vmatmul.msk.bf16.vlgmr.msrb.gmra.mxu0 %vm696_vm9, %v984_v49 }
 0x3d9   : > { %1662 = vmatmul.msk.bf16.vlgmr.msra.gmra.mxu2 %vm696_vm9, %v1047_v51 }
 0x3da   : > { %1324 = vmatpush.bf16.msrb.mxu0 %v1738_v43 }
 0x3dc   : > { %v1110_v52 = vpop.xlane.xlu0 %1109 }
 0x3dd   : > { %1822 = vrcp.f32 %v1110_v52 }
 0x3de   : > { %1325 = vmatpush.bf16.msrb.mxu0 %v1737_v48 }
 0x3e3   : > { %v1823_v53 = vpop.eup %1822 }
 0x3e4   : > { %v1112_v54 = vmul.f32 %v1823_v53, %v1809_v17 }
 0x3e6   : > { %v1113_v55 = vpack.c.bf16 %v1112_v54, %v1112_v54 }
 0x3e8   : > { %1664 = vmatmul.msk.bf16.vlgmr.msra.gmra.mxu0 %vm696_vm9, %v1113_v55 }
 0x3ef   : > { %v1178_v56 = vpop.permute.xlu0 %1177 }
 0x3f0   : > { %v1183_v57 = vsel %vm733_vm10, %v1178_v56, 0 }
 0x3f1   : > { %1192 = vmatpush.bf16.msrb.mxu2 %v1183_v57 }
 0x408   : > { %v1173_v58 = vpop.xlane.xlu1 %1172 }
 0x409   : > { %1824 = vrcp.f32 %v1173_v58 }
 0x40f   : > { %v1825_v59 = vpop.eup %1824 }
 0x410   : > { %v1175_v60 = vmul.f32 %v1825_v59, %v1811_v23 }
 0x412   : > { %v1176_v61 = vpack.c.bf16 %v1175_v60, %v1175_v60 }
 0x414   : > { %1666 = vmatmul.msk.bf16.vlgmr.msrb.gmra.mxu2 %vm696_vm9, %v1176_v61 }
 0x42e   : > { %v814_v62 = vpop.f32.mrf.mxu2 }
 0x42f   : > { %819 = vrot.lane.b32.xlu1 %v814_v62, %s1894_s20 }
 0x436   : > { %v816_v63 = vpop.f32.mrf.mxu2 }
 0x445   : > { %v878_v0 = vpop.f32.mrf.mxu0  ;;  %v942_v1 = vpop.f32.mrf.mxu2 }
 0x446   : > { %883 = vrot.lane.b32.xlu0 %v878_v0, %s1895_s24 }
 0x44d   : > { %v880_v3 = vpop.f32.mrf.mxu0  ;;  %v944_v5 = vpop.f32.mrf.mxu2 }
 0x44e   : > { %v1291_v5 = vperm.slane %v2052_v46, 3 }
 0x455   : > { %v1000_v6 = vpop.f32.mrf.mxu0 }
 0x456   : > { %1004 = vst.msk [vmem:[#allocation3 + $0x8] sm:$0xff] %vm696_vm9, %v1000_v6 }
 0x45c   : > { %v1068_v7 = vpop.f32.mrf.mxu2 }
 0x45d   : > { %1073 = vrot.lane.b32.xlu0 %v1068_v7, %s1894_s20  ;;  %v1002_v8 = vpop.f32.mrf.mxu0 }
 0x464   : > { %v1070_v9 = vpop.f32.mrf.mxu2 }
 0x465   : > { %947 = vrot.lane.b32.xlu0 %v942_v1, %s1896_s27  ;;  %v1131_v10 = vpop.f32.mrf.mxu0 }
 0x466   : > { %1136 = vrot.lane.b32.xlu2 %v1131_v10, %s1895_s24 }
 0x46d   : > { %v1133_v11 = vpop.f32.mrf.mxu0 }
 0x497   : > { %v1194_v13 = vpop.f32.mrf.mxu2 }
 0x498   : > { %1199 = vrot.lane.b32.xlu2 %v1194_v13, %s1896_s27  ;;  %v1746_v13 = vld [vmem:[%s2018_s30 + $0x38] sm:$0xff] }
 0x499   : > { %1415 = vmatpush.bf16.msra.mxu1 %v1746_v13 }
 0x49f   : > { %v1196_v14 = vpop.f32.mrf.mxu2 }
 0x4a0   : > { %v1745_v14 = vld [vmem:[%s2018_s30 + $0x30] sm:$0xff] }
 0x4a1   : > { %v820_v18 = vpop.permute.xlu1 %819  ;;  %1416 = vmatpush.bf16.msra.mxu1 %v1745_v14 }
 0x4a2   : > { %823 = vst.msk [vmem:[#allocation3] sm:$0xff] %vm822_vm11, %v820_v18  ;;  %v1744_v18 = vld [vmem:[%s2018_s30 + $0x28] sm:$0xff] }
 0x4a5   : > { %1417 = vmatpush.bf16.msra.mxu1 %v1744_v18 }
 0x4b8   : > { %v884_v15 = vpop.permute.xlu0 %883 }
 0x4b9   : > { %887 = vst.msk [vmem:[#allocation3] sm:$0xff] %vm886_vm12, %v884_v15  ;;  %v1742_v15 = vld [vmem:[%s2018_s30 + $0x18] sm:$0xff] }
 0x4c0   : > { %v1137_v17 = vpop.permute.xlu2 %1136 }
 0x4cf   : > { %v1074_v16 = vpop.permute.xlu0 %1073 }
 0x4d0   : > { %1076 = vst.msk [vmem:[#allocation3 + $0x8] sm:$0xff] %vm822_vm11, %v1074_v16  ;;  %v1741_v16 = vld [vmem:[%s2018_s30 + $0x10] sm:$0xff] }
 0x4d1   : > { %1139 = vst.msk [vmem:[#allocation3 + $0x8] sm:$0xff] %vm886_vm12, %v1137_v17  ;;  %v1740_v17 = vld [vmem:[%s2018_s30 + $0x8] sm:$0xff] }
 0x4d7   : > { %v948_v21 = vpop.permute.xlu0 %947 }
 0x4d8   : > { %951 = vst.msk [vmem:[#allocation3] sm:$0xff] %vm950_vm13, %v948_v21  ;;  %v1739_v21 = vld [vmem:[%s2018_s30] sm:$0xff] }
 0x4df   : > { %v1203_v23 = vld [vmem:[#allocation3] sm:$0xff] }
 0x4f2   : > { %v1200_v22 = vpop.permute.xlu2 %1199 }
 0x4f3   : > { %1202 = vst.msk [vmem:[#allocation3 + $0x8] sm:$0xff] %vm950_vm13, %v1200_v22 }
 0x4fa   : > { %v1204_v25 = vld [vmem:[#allocation3 + $0x8] sm:$0xff] }
 0x4fb   : > { %v1205_v26 = vpack.c.bf16 %v1204_v25, %v1203_v23 }
 0x4fd   : > { %1675 = vmatmul.msk.bf16.vlgmr.msra.gmra.mxu3 %vm534_vm1, %v1205_v26 }
 0x580   : > { %v1234_v28 = vpop.f32.mrf.mxu3 }
 0x581   : > { %v1239_v29 = vadd.f32 %v1234_v28, %v2027_v2 }
 0x583   : > { %v2186_v30 = vadd.f32 %v1241_v27, %v1239_v29 }
 0x585   : > { %v1244_v31 = vsel %vm534_vm1, %v2186_v30, 0.0 }
 0x586   : > { %1245 = vadd.xlane.f32.xlu1 %v1244_v31 }
 0x588   : > { %v1236_v32 = vpop.f32.mrf.mxu3 }
 0x589   : > { %v1240_v24 = vadd.f32 %v1236_v32, %v2031_v4 }
 0x58b   : > { %v2191_v33 = vadd.f32 %v1241_v27, %v1240_v24 }
 0x58d   : > { %v1247_v34 = vsel %vm534_vm1, %v2191_v33, 0.0 }
 0x58e   : > { %1248 = vadd.xlane.f32.xlu0 %v1247_v34 }
 0x5f9   : > { %v1246_v35 = vpop.xlane.xlu1 %1245 }
 0x5fa   : > { %v1250_v36 = vmul.f32 %v1246_v35, %v2035_v12 }
 0x5fc   : > { %v1252_v2 = vsub.f32 %v2186_v30, %v1250_v36 }
 0x5fe   : > { %v1254_v38 = vmul.f32 %v1252_v2, %v1252_v2 }
 0x600   : > { %v1256_v37 = vsel %vm534_vm1, %v1254_v38, 0.0 }
 0x601   : > { %1257 = vadd.xlane.f32.xlu2 %v1256_v37  ;;  %v1249_v39 = vpop.xlane.xlu0 %1248 }
 0x602   : > { %v1251_v4 = vmul.f32 %v1249_v39, %v2035_v12 }
 0x604   : > { %v1253_v40 = vsub.f32 %v2191_v33, %v1251_v4 }
 0x606   : > { %v1255_v41 = vmul.f32 %v1253_v40, %v1253_v40 }
 0x608   : > { %v1259_v42 = vsel %vm534_vm1, %v1255_v41, 0.0 }
 0x609   : > { %1260 = vadd.xlane.f32.xlu1 %v1259_v42 }
 0x674   : > { %v1258_v44 = vpop.xlane.xlu2 %1257 }
 0x675   : > { %v1262_v45 = vmul.f32 %v1258_v44, %v2035_v12  ;;  %v1787_v44 = vld [vmem:[%s1987_s25 + $0x8] ss:$0 sm:$0xff] }
 0x677   : > { %v1264_v47 = vadd.f32 1e-05, %v1262_v45 }
 0x679   : > { %1826 = vrsqrt.f32 %v1264_v47  ;;  %vm1272_vm15 = vweird.f32 %v1264_v47 }
 0x67c   : > { %v1261_v49 = vpop.xlane.xlu1 %1260 }
 0x67d   : > { %v1263_v50 = vmul.f32 %v1261_v49, %v2035_v12  ;;  %v1288_v12 = vperm.slane %v2052_v46, 2  ;;  %v1743_v46 = vld [vmem:[%s2018_s30 + $0x20] sm:$0xff] }
 0x67e   : > { %1418 = vmatpush.bf16.msra.mxu1 %v1743_v46 }
 0x67f   : > { %v1827_v51 = vpop.eup %1826  ;;  %v1265_v52 = vadd.f32 1e-05, %v1263_v50 }
 0x680   : > { %v1267_v53 = vmul.f32 %v1827_v51, %v1264_v47  ;;  %vm1273_vm14 = vweird.f32 %v1827_v51 }
 0x681   : > { %1828 = vrsqrt.f32 %v1265_v52  ;;  %vm1274_vm0 = vmor %vm1272_vm15, %vm1273_vm14  ;;  %vm1282_vm3 = vweird.f32 %v1265_v52 }
 0x682   : > { %v1268_v54 = vmul.f32 %v1827_v51, %v1267_v53  ;;  %1419 = vmatpush.bf16.msra.mxu1 %v1742_v15 }
 0x684   : > { %v1269_v55 = vmul.f32 0.5, %v1268_v54 }
 0x686   : > { %v1270_v56 = vsub.f32 1.5, %v1269_v55  ;;  %1420 = vmatpush.bf16.msra.mxu1 %v1741_v16 }
 0x687   : > { %v1829_v57 = vpop.eup %1828 }
 0x688   : > { %v1271_v58 = vmul.f32 %v1827_v51, %v1270_v56  ;;  %v1277_v59 = vmul.f32 %v1829_v57, %v1265_v52  ;;  %vm1283_vm2 = vweird.f32 %v1829_v57 }
 0x689   : > { %vm1284_vm4 = vmor %vm1282_vm3, %vm1283_vm2 }
 0x68a   : > { %v1278_v60 = vmul.f32 %v1829_v57, %v1277_v59  ;;  %v1275_v61 = vsel %vm1274_vm0, %v1827_v51, %v1271_v58  ;;  %1421 = vmatpush.bf16.msra.mxu1 %v1740_v17 }
 0x68b   : > { %v1286_v0 = vmul.f32 %v1275_v61, %v1252_v2 }
 0x68c   : > { %v1279_v62 = vmul.f32 0.5, %v1278_v60 }
 0x68d   : > { %v1289_v6 = vmul.f32 %v1288_v12, %v1286_v0 }
 0x68e   : > { %v1280_v63 = vsub.f32 1.5, %v1279_v62  ;;  %1422 = vmatpush.bf16.msra.mxu1 %v1739_v21 }
 0x68f   : > { %v1292_v9 = vadd.f32 %v1291_v5, %v1289_v6 }
 0x690   : > { %v1281_v1 = vmul.f32 %v1829_v57, %v1280_v63 }
 0x692   : > { %v1285_v3 = vsel %vm1284_vm4, %v1829_v57, %v1281_v1 }
 0x693   : > { %v1287_v7 = vmul.f32 %v1285_v3, %v1253_v40 }
 0x695   : > { %v1290_v8 = vmul.f32 %v1288_v12, %v1287_v7 }
 0x697   : > { %v1293_v10 = vadd.f32 %v1291_v5, %v1290_v8 }
 0x699   : > { %v1294_v11 = vpack.c.bf16 %v1293_v10, %v1292_v9 }
 0x69b   : > { %1684 = vmatmul.msk.bf16.vlgmr.msrb.gmra.mxu0 %vm534_vm1, %v1294_v11 }
 0x718   : > { %v1327_v20 = vpop.f32.mrf.mxu0 }
 0x719   : > { %v1328_v22 = vadd.f32 %v1786_v19, %v1327_v20 }
 0x71b   : > { %v1332_v23 = vmul.f32 %v1328_v22, %v1328_v22 }
 0x71d   : > { %v1334_v25 = vmul.f32 %v1332_v23, %v1328_v22 }
 0x71f   : > { %v1336_v26 = vmul.f32 0.044715, %v1334_v25 }
 0x720   : > { %v1329_v27 = vpop.f32.mrf.mxu0 }
 0x721   : > { %v1338_v28 = vadd.f32 %v1336_v26, %v1328_v22  ;;  %v1330_v29 = vadd.f32 %v1786_v19, %v1329_v27 }
 0x723   : > { %v1340_v31 = vmul.f32 0.7978846, %v1338_v28  ;;  %v1333_v32 = vmul.f32 %v1330_v29, %v1330_v29 }
 0x725   : > { %v1335_v24 = vmul.f32 %v1333_v32, %v1330_v29  ;;  %1830 = vtanh.f32 %v1340_v31 }
 0x727   : > { %v1337_v34 = vmul.f32 0.044715, %v1335_v24 }
 0x729   : > { %v1339_v35 = vadd.f32 %v1337_v34, %v1330_v29 }
 0x72b   : > { %v1341_v36 = vmul.f32 0.7978846, %v1339_v35  ;;  %v1831_v2 = vpop.eup %1830 }
 0x72c   : > { %v1344_v38 = vadd.f32 1.0, %v1831_v2 }
 0x72d   : > { %1832 = vtanh.f32 %v1341_v36 }
 0x72e   : > { %v1346_v39 = vmul.f32 0.5, %v1344_v38 }
 0x730   : > { %v1348_v41 = vmul.f32 %v1346_v39, %v1328_v22 }
 0x733   : > { %v1833_v37 = vpop.eup %1832 }
 0x734   : > { %v1345_v4 = vadd.f32 1.0, %v1833_v37 }
 0x736   : > { %v1347_v40 = vmul.f32 0.5, %v1345_v4 }
 0x738   : > { %v1349_v42 = vmul.f32 %v1347_v40, %v1330_v29 }
 0x73a   : > { %v1350_v43 = vpack.c.bf16 %v1349_v42, %v1348_v41 }
 0x73c   : > { %1423 = vmatmul.bf16.vlgmr.msra.gmra.mxu1 %v1350_v43 }
 0x7b9   : > { %v1424_v45 = vpop.f32.mrf.mxu1 }
 0x7ba   : > { %v1429_v47 = vadd.f32 %v1424_v45, %v2186_v30 }
 0x7bc   : > { %v1432_v48 = vadd.f32 %v1787_v44, %v1429_v47 }
 0x7be   : > { %1434 = vst.msk [vmem:[#allocation2] sm:$0xff] %vm534_vm1, %v1432_v48 }
 0x7c1   : > { %v1426_v49 = vpop.f32.mrf.mxu1 }
 0x7c2   : > { %v1430_v50 = vadd.f32 %v1426_v49, %v2191_v33  ;;  %1439 = sbr.rel (%p1717_p6) target bundleno = 1999 (0x7cf), region = 68 }
 0x7c4   : > { %v1433_v51 = vadd.f32 %v1787_v44, %v1430_v50 }
 0x7c6   : > { %1435 = vst.msk [vmem:[#allocation2 + $0x8] sm:$0xff] %vm534_vm1, %v1433_v51 }
 0x7c7   : > { %v1440_v52 = vld [vmem:[#allocation2] sm:$0xff] }
 0x7c8   : > { %1442 = vst.msk [vmem:[#allocation4] sm:$0xff] %vm534_vm1, %v1440_v52 }
 0x7cd   : > { %v1441_v53 = vld [vmem:[#allocation2 + $0x8] sm:$0xff] }
 0x7ce   : > { %1443 = vst.msk [vmem:[#allocation4 + $0x8] sm:$0xff] %vm534_vm1, %v1441_v53 }
 0x7cf PF: > { %s2260_s18 = sadd.s32 4294967295, %s1888_s15   ;;  %s1454_s16 = sshll.u32 %s2254_s10, 4  ;;  %s1455_s16 = int_to_ptr.hbm [resolvable:$true] %s1454_s16 }
 0x7d0   : > { %p1751_p7 = scmp.eq.s32.totalorder %s2260_s18, 1  ;;  %s1897_s12 = smov [#allocation4]  }
 0x7d1   : > { %s1452_s22 = sshll.u32 %s1897_s12, 4  ;;  %s1898_s13 = smov 128   ;;  %s1453_s22 = int_to_ptr.vmem [resolvable:$true] %s1452_s22 }
 0x7d2   : > { %1748 = dma.vmem_to_hbm [thread:$0]  (%p1751_p7), %s1453_s22, 256, %s1455_s16, [#allocation5], %s1898_s13, %s1898_s13, %s1894_s20  }
 0x7d3   : > { %1875 = dma.done.wait (%p1751_p7), [#allocation5], 256  }
 0x7d4   : > { %1877 = vsyncadd (%p1751_p7), [#allocation5], 4294967040 }
 0x7d5 PF: > { %s21_s15 = sadd.s32 1, %s1888_s15   ;;  %s2261_s13 = smov %s1884_s14 }
 0x7d6   : > { %p18_p8 = scmp.ge.s32.totalorder %s21_s15, 4   ;;  %s2262_s14 = smov %s2264_s17 }
 0x7d8   :  { %20 = sbr.rel (!%p18_p8) target bundleno = 5 (0x5), region = 120 }
 0x7dd   :  { %1471 = vsyncpa [#allocation5], 1 }
 0x7de   :  { %1473 = vsyncpa [#allocation5 + $0x1], 1 }

</bundles_post_ra>
